<compile_context>
chip_gen: v6e
topology: v6e:2x2x1
jax: 0.10.0
libtpu: 0.0.40
codegen_flags: <defaults>
</compile_context>

<pallas_src>
import functools

import jax
import jax.numpy as jnp
from jax.experimental import pallas as pl
from jax.experimental.pallas import tpu as pltpu

EPS = 1e-5          # nn.InstanceNorm2d default eps (affine=False)
NEG_SLOPE = 0.2     # nn.LeakyReLU(negative_slope=0.2)
LANE = 128          # TPU lane width


def _round_up(x, m):
    return (x + m - 1) // m * m


def _pad_last(a, target):
    pad = target - a.shape[-1]
    if pad == 0:
        return a
    widths = [(0, 0)] * (a.ndim - 1) + [(0, pad)]
    return jnp.pad(a, widths)


# ----------------------------- Pallas kernel ---------------------------------
def _make_fused_kernel(taps, Ho, Wo, has_add):
    """Fused shifted-window conv + bias + InstanceNorm + LeakyReLU (+ optional add)."""
    P = Ho * Wo
    inv_p = 1.0 / float(P)

    def kernel(*refs):
        if has_add:
            x_ref, w_ref, b_ref, add_ref, out_ref, acc_ref = refs
        else:
            x_ref, w_ref, b_ref, out_ref, acc_ref = refs

        # Conv as T shifted (P, Cin_p) @ (Cin_p, Cout_p) bf16 matmuls,
        # accumulated in the f32 VMEM scratch (no HBM im2col).
        for t, (dh, dw) in enumerate(taps):
            xt = x_ref[0, dh:dh + Ho, dw:dw + Wo, :]           # (Ho, Wo, Cin_p) bf16
            xt = xt.reshape(P, xt.shape[-1])                   # (P, Cin_p)
            contrib = jnp.dot(xt, w_ref[t],
                              preferred_element_type=jnp.float32)
            if t == 0:
                acc_ref[...] = contrib
            else:
                acc_ref[...] += contrib

        y = acc_ref[...] + b_ref[...]                          # (P, Cout_p) f32

        # InstanceNorm2d (per-channel over spatial), one-pass stats:
        # var = E[y^2] - mean^2, clamped at 0 (biased variance, matches PyTorch).
        s1 = jnp.sum(y, axis=0, keepdims=True)                 # (1, Cout_p)
        s2 = jnp.sum(y * y, axis=0, keepdims=True)
        mean = s1 * inv_p
        var = jnp.maximum(s2 * inv_p - mean * mean, 0.0)
        y = (y - mean) * jax.lax.rsqrt(var + EPS)              # rsqrt -> EUP

        # LeakyReLU(0.2): max(y, 0.2*y) is exact since slope < 1.
        y = jnp.maximum(y, NEG_SLOPE * y)

        if has_add:
            y = y + add_ref[0]                                 # fused ctff add

        out_ref[0] = y.astype(out_ref.dtype)

    return kernel


def _fused_conv_call(x, w_taps, bias, taps, Ho, Wo, add=None):
    """x: (N, Hin, Win, Cin_p) bf16; w_taps: (T, Cin_p, Cout_p) bf16;
    bias: (1, Cout_p) f32; add: (N, P, Cout_p) f32 or None.
    Returns (N, P, Cout_p) bf16."""
    N, Hin, Win, Cin_p = x.shape
    T, _, Cout_p = w_taps.shape
    P = Ho * Wo

    kernel = _make_fused_kernel(taps, Ho, Wo, add is not None)

    in_specs = [
        pl.BlockSpec((1, Hin, Win, Cin_p), lambda n: (n, 0, 0, 0)),
        pl.BlockSpec((T, Cin_p, Cout_p), lambda n: (0, 0, 0)),
        pl.BlockSpec((1, Cout_p), lambda n: (0, 0)),
    ]
    args = [x, w_taps, bias]
    if add is not None:
        in_specs.append(pl.BlockSpec((1, P, Cout_p), lambda n: (n, 0, 0)))
        args.append(add)

    # Scoped-VMEM budget: double-buffered input/output blocks + weights +
    # bias + f32 accumulator scratch (+ optional add block), with 2x headroom.
    est = (2 * Hin * Win * Cin_p * 2            # input block, bf16, double-buffered
           + 2 * P * Cout_p * 2                 # output block, bf16, double-buffered
           + T * Cin_p * Cout_p * 2             # weights, bf16
           + Cout_p * 4                         # bias
           + P * Cout_p * 4)                    # f32 accumulator scratch
    if add is not None:
        est += 2 * P * Cout_p * 4
    vmem_limit = max(32 * 1024 * 1024, min(2 * est, 100 * 1024 * 1024))

    return pl.pallas_call(
        kernel,
        out_shape=jax.ShapeDtypeStruct((N, P, Cout_p), jnp.bfloat16),
        grid_spec=pltpu.PrefetchScalarGridSpec(
            num_scalar_prefetch=0,
            grid=(N,),
            in_specs=in_specs,
            out_specs=pl.BlockSpec((1, P, Cout_p), lambda n: (n, 0, 0)),
            scratch_shapes=[pltpu.VMEM((P, Cout_p), jnp.float32)],
        ),
        compiler_params=pltpu.CompilerParams(
            dimension_semantics=("parallel",),
            vmem_limit_bytes=vmem_limit,
        ),
    )(*args)


# ------------------------------- JAX glue -------------------------------------
def _conv_stage(x_nhwc, w_oihw, bias, stride, add_nhwc=None):
    """One Conv2d(3x3, pad=1) + InstanceNorm + LeakyReLU (+ optional residual add).

    x_nhwc: (N, H, W, Cx) where Cx >= Cin and channels [Cin:Cx] are zero
    (lets the second conv consume the lane-padded activation directly).
    Returns (out_flat_bf16 (N, Ho*Wo, Cout_p), Ho, Wo, Cout_p).
    """
    N, H, W, Cx = x_nhwc.shape
    Cout, Cin, KH, KW = w_oihw.shape
    assert (KH, KW) == (3, 3)

    if stride == 1:
        Ho, Wo = H, W
        x_eff = jnp.pad(x_nhwc, ((0, 0), (1, 1), (1, 1), (0, 0)))
        taps = tuple((i, j) for i in range(3) for j in range(3))
        w_t = jnp.transpose(w_oihw, (2, 3, 1, 0)).reshape(9, Cin, Cout)
        if Cx > Cin:
            w_t = jnp.pad(w_t, ((0, 0), (0, Cx - Cin), (0, 0)))
        Cin_eff = Cx
    elif stride == 2:
        Ho, Wo = (H - 1) // 2 + 1, (W - 1) // 2 + 1
        Hp_ev = _round_up(H + 2, 2)
        Wp_ev = _round_up(W + 2, 2)
        xp = jnp.pad(x_nhwc, ((0, 0), (1, Hp_ev - H - 1), (1, Wp_ev - W - 1), (0, 0)))
        Hb, Wb = Hp_ev // 2, Wp_ev // 2
        # space-to-depth: the stride-2 3x3 conv becomes a 2x2-tap stride-1
        # conv over 4*Cx channels (no strided reads inside the kernel).
        xs = xp.reshape(N, Hb, 2, Wb, 2, Cx)
        x_eff = jnp.transpose(xs, (0, 1, 3, 2, 4, 5)).reshape(N, Hb, Wb, 4 * Cx)
        taps = ((0, 0), (0, 1), (1, 0), (1, 1))
        w_k = jnp.transpose(w_oihw, (2, 3, 1, 0))          # (3, 3, Cin, Cout)
        tap_mats = []
        for di in range(2):
            for dj in range(2):
                blocks = []
                for ph in range(2):
                    for pw in range(2):
                        kh, kw = 2 * di + ph, 2 * dj + pw
                        if kh < 3 and kw < 3:
                            blk = w_k[kh, kw]               # (Cin, Cout)
                        else:
                            blk = jnp.zeros((Cin, Cout), w_oihw.dtype)
                        if Cx > Cin:
                            blk = jnp.pad(blk, ((0, Cx - Cin), (0, 0)))
                        blocks.append(blk)
                tap_mats.append(jnp.concatenate(blocks, axis=0))   # (4*Cx, Cout)
        w_t = jnp.stack(tap_mats, axis=0)                          # (4, 4*Cx, Cout)
        Cin_eff = 4 * Cx
    else:
        raise NotImplementedError("stride must be 1 or 2")  # TODO(synk): general stride

    # Lane-dense channel padding (multiples of 128) + bf16 matmul operands.
    Cin_p = _round_up(Cin_eff, LANE)
    Cout_p = _round_up(Cout, LANE)
    x_eff = _pad_last(x_eff, Cin_p).astype(jnp.bfloat16)
    w_t = _pad_last(jnp.pad(w_t, ((0, 0), (0, Cin_p - Cin_eff), (0, 0))), Cout_p)
    w_t = w_t.astype(jnp.bfloat16)
    b_p = _pad_last(bias.reshape(1, -1), Cout_p).astype(jnp.float32)

    add_p = None
    if add_nhwc is not None:
        add_p = _pad_last(add_nhwc.reshape(N, Ho * Wo, Cout), Cout_p)
        add_p = add_p.astype(jnp.float32)

    out = _fused_conv_call(x_eff, w_t, b_p, taps, Ho, Wo, add=add_p)
    return out, Ho, Wo, Cout_p


def init_downconv_params(key, in_size, out_size):
    """Deterministic synthetic parameters (PyTorch Conv2d-style shapes/init)."""
    k1, k2, k3, k4 = jax.random.split(key, 4)
    fan1 = in_size * 9
    fan2 = out_size * 9
    w1 = jax.random.uniform(k1, (out_size, in_size, 3, 3), jnp.float32,
                            -1.0 / jnp.sqrt(fan1), 1.0 / jnp.sqrt(fan1))
    b1 = jax.random.uniform(k2, (out_size,), jnp.float32,
                            -1.0 / jnp.sqrt(fan1), 1.0 / jnp.sqrt(fan1))
    w2 = jax.random.uniform(k3, (out_size, out_size, 3, 3), jnp.float32,
                            -1.0 / jnp.sqrt(fan2), 1.0 / jnp.sqrt(fan2))
    b2 = jax.random.uniform(k4, (out_size,), jnp.float32,
                            -1.0 / jnp.sqrt(fan2), 1.0 / jnp.sqrt(fan2))
    return {"w1": w1, "b1": b1, "w2": w2, "b2": b2}


@functools.partial(jax.jit, static_argnames=("stride",))
def down_conv_forward(x_nchw, params, stride=2, ctff_outputs=None):
    """Matches DownConv.forward; returns (outputs, output1) in NCHW, f32."""
    x = jnp.transpose(x_nchw, (0, 2, 3, 1)).astype(jnp.float32)       # NHWC
    N = x.shape[0]
    Cout = params["w1"].shape[0]

    add = None
    if ctff_outputs is not None:
        add = jnp.transpose(ctff_outputs, (0, 2, 3, 1)).astype(jnp.float32)

    # conv1 + InstanceNorm + LeakyReLU (+ fused ctff add), stride = `stride`
    out1_p, Ho, Wo, Cp = _conv_stage(x, params["w1"], params["b1"], stride,
                                     add_nhwc=add)

    # conv2 + InstanceNorm + LeakyReLU, stride 1; consumes the lane-padded
    # bf16 activation directly (zero-padded channels meet zero weight rows).
    x2 = out1_p.reshape(N, Ho, Wo, Cp)
    out2_p, Ho2, Wo2, _ = _conv_stage(x2, params["w2"], params["b2"], 1)

    output1 = out1_p[:, :, :Cout].reshape(N, Ho, Wo, Cout)
    outputs = out2_p[:, :, :Cout].reshape(N, Ho2, Wo2, Cout)
    outputs = jnp.transpose(outputs, (0, 3, 1, 2)).astype(jnp.float32)   # NCHW
    output1 = jnp.transpose(output1, (0, 3, 1, 2)).astype(jnp.float32)   # NCHW
    return outputs, output1


# --------------------------- plain-JAX reference -------------------------------
def _ref_downconv(x_nchw, params, stride=2, ctff_outputs=None):
    def conv(x, w, b, s):
        y = jax.lax.conv_general_dilated(
            x, w, window_strides=(s, s), padding=((1, 1), (1, 1)),
            dimension_numbers=("NCHW", "OIHW", "NCHW"))
        return y + b.reshape(1, -1, 1, 1)

    def inorm(y):
        m = jnp.mean(y, axis=(2, 3), keepdims=True)
        v = jnp.mean((y - m) ** 2, axis=(2, 3), keepdims=True)
        return (y - m) / jnp.sqrt(v + EPS)

    def lrelu(y):
        return jnp.where(y >= 0, y, NEG_SLOPE * y)

    o1 = lrelu(inorm(conv(x_nchw, params["w1"], params["b1"], stride)))
    if ctff_outputs is not None:
        o1 = o1 + ctff_outputs
    o2 = lrelu(inorm(conv(o1, params["w2"], params["b2"], 1)))
    return o2, o1


# ----------------------------------- main --------------------------------------
if __name__ == "__main__":
    key = jax.random.PRNGKey(0)
    kx, kp, kc = jax.random.split(key, 3)

    N, Cin, H, W = 2, 4, 16, 16
    Cout = 8
    x = jax.random.normal(kx, (N, Cin, H, W), jnp.float32)
    params = init_downconv_params(kp, Cin, Cout)

    # --- ctff_outputs=None path ---
    outputs, output1 = down_conv_forward(x, params, stride=2)
    jax.block_until_ready((outputs, output1))
    assert outputs.shape == (N, Cout, H // 2, W // 2)
    assert output1.shape == (N, Cout, H // 2, W // 2)

    ref_out, ref_out1 = _ref_downconv(x, params, stride=2)
    # bf16 matmul operands + bf16 activation storage => loose tolerance vs f32 ref.
    assert jnp.allclose(outputs, ref_out, atol=8e-2, rtol=8e-2), \
        float(jnp.max(jnp.abs(outputs - ref_out)))
    assert jnp.allclose(output1, ref_out1, atol=8e-2, rtol=8e-2), \
        float(jnp.max(jnp.abs(output1 - ref_out1)))

    # --- ctff_outputs path (add fused into the conv1 kernel epilogue) ---
    ctff = jax.random.normal(kc, (N, Cout, H // 2, W // 2), jnp.float32)
    outputs_c, output1_c = down_conv_forward(x, params, stride=2,
                                             ctff_outputs=ctff)
    jax.block_until_ready((outputs_c, output1_c))
    ref_out_c, ref_out1_c = _ref_downconv(x, params, stride=2, ctff_outputs=ctff)
    assert jnp.allclose(outputs_c, ref_out_c, atol=8e-2, rtol=8e-2), \
        float(jnp.max(jnp.abs(outputs_c - ref_out_c)))
    assert jnp.allclose(output1_c, ref_out1_c, atol=8e-2, rtol=8e-2), \
        float(jnp.max(jnp.abs(output1_c - ref_out1_c)))

    print("KERNEL_OK")
</pallas_src>

<mosaic_0001>
module attributes {stable_mosaic.version = 11 : i64} {
  func.func @kernel(%arg0: i32, %arg1: memref<1x9x9x128xbf16, #tpu.memory_space<vmem>>, %arg2: memref<4x128x128xbf16, #tpu.memory_space<vmem>>, %arg3: memref<1x128xf32, #tpu.memory_space<vmem>>, %arg4: memref<1x64x128xbf16, #tpu.memory_space<vmem>>, %arg5: memref<64x128xf32, #tpu.memory_space<vmem>>) attributes {dimension_semantics = [#tpu.dimension_semantics<parallel>], iteration_bounds = array<i64: 2>, scalar_prefetch = 0 : i64, scratch_operands = 1 : i64, tpu.core_type = #tpu.core_type<tc>, window_params = [{transform_indices = @transform_0, window_bounds = array<i64: 1, 9, 9, 128>}, {pipeline_mode = #tpu.pipeline_mode<synchronous>, transform_indices = @transform_1, window_bounds = array<i64: 4, 128, 128>}, {pipeline_mode = #tpu.pipeline_mode<synchronous>, transform_indices = @transform_2, window_bounds = array<i64: 1, 128>}, {transform_indices = @transform_3, window_bounds = array<i64: 1, 64, 128>}]} {
    %c0 = arith.constant 0 : index
    %c0_0 = arith.constant 0 : index
    %c0_1 = arith.constant 0 : index
    %c0_2 = arith.constant 0 : index
    %0 = vector.load %arg1[%c0, %c0_0, %c0_1, %c0_2] : memref<1x9x9x128xbf16, #tpu.memory_space<vmem>>, vector<1x8x8x128xbf16>
    %1 = vector.shape_cast %0 : vector<1x8x8x128xbf16> to vector<8x8x128xbf16>
    %2 = vector.shape_cast %1 : vector<8x8x128xbf16> to vector<64x128xbf16>
    %c0_3 = arith.constant 0 : index
    %c0_4 = arith.constant 0 : index
    %c0_5 = arith.constant 0 : index
    %3 = vector.load %arg2[%c0_3, %c0_4, %c0_5] : memref<4x128x128xbf16, #tpu.memory_space<vmem>>, vector<1x128x128xbf16>
    %4 = vector.shape_cast %3 : vector<1x128x128xbf16> to vector<128x128xbf16>
    %cst = arith.constant dense<0.000000e+00> : vector<64x128xf32>
    %5 = tpu.matmul %2, %4, %cst {dimension_numbers = #tpu.dot_dimension_numbers<[1], [0], [0], [1], [0, 0, 1, 1], [], []>} : vector<64x128xbf16>, vector<128x128xbf16>, vector<64x128xf32> -> vector<64x128xf32>
    %c0_6 = arith.constant 0 : index
    %c0_7 = arith.constant 0 : index
    %6 = vector.load %arg5[%c0_6, %c0_7] : memref<64x128xf32, #tpu.memory_space<vmem>>, vector<64x128xf32>
    tpu.vector_store %arg5[%c0_6, %c0_7], %5 {strides = array<i32>} : memref<64x128xf32, #tpu.memory_space<vmem>>, vector<64x128xf32>,
    %c0_8 = arith.constant 0 : index
    %c0_9 = arith.constant 0 : index
    %c1 = arith.constant 1 : index
    %c0_10 = arith.constant 0 : index
    %7 = vector.load %arg1[%c0_8, %c0_9, %c1, %c0_10] : memref<1x9x9x128xbf16, #tpu.memory_space<vmem>>, vector<1x8x8x128xbf16>
    %8 = vector.shape_cast %7 : vector<1x8x8x128xbf16> to vector<8x8x128xbf16>
    %9 = vector.shape_cast %8 : vector<8x8x128xbf16> to vector<64x128xbf16>
    %c1_11 = arith.constant 1 : index
    %c0_12 = arith.constant 0 : index
    %c0_13 = arith.constant 0 : index
    %10 = vector.load %arg2[%c1_11, %c0_12, %c0_13] : memref<4x128x128xbf16, #tpu.memory_space<vmem>>, vector<1x128x128xbf16>
    %11 = vector.shape_cast %10 : vector<1x128x128xbf16> to vector<128x128xbf16>
    %cst_14 = arith.constant dense<0.000000e+00> : vector<64x128xf32>
    %12 = tpu.matmul %9, %11, %cst_14 {dimension_numbers = #tpu.dot_dimension_numbers<[1], [0], [0], [1], [0, 0, 1, 1], [], []>} : vector<64x128xbf16>, vector<128x128xbf16>, vector<64x128xf32> -> vector<64x128xf32>
    %c0_15 = arith.constant 0 : index
    %c0_16 = arith.constant 0 : index
    %13 = vector.load %arg5[%c0_15, %c0_16] : memref<64x128xf32, #tpu.memory_space<vmem>>, vector<64x128xf32>
    %14 = arith.addf %13, %12 : vector<64x128xf32>
    %c0_17 = arith.constant 0 : index
    %c0_18 = arith.constant 0 : index
    %15 = vector.load %arg5[%c0_17, %c0_18] : memref<64x128xf32, #tpu.memory_space<vmem>>, vector<64x128xf32>
    tpu.vector_store %arg5[%c0_17, %c0_18], %14 {strides = array<i32>} : memref<64x128xf32, #tpu.memory_space<vmem>>, vector<64x128xf32>,
    %c0_19 = arith.constant 0 : index
    %c1_20 = arith.constant 1 : index
    %c0_21 = arith.constant 0 : index
    %c0_22 = arith.constant 0 : index
    %16 = vector.load %arg1[%c0_19, %c1_20, %c0_21, %c0_22] : memref<1x9x9x128xbf16, #tpu.memory_space<vmem>>, vector<1x8x8x128xbf16>
    %17 = vector.shape_cast %16 : vector<1x8x8x128xbf16> to vector<8x8x128xbf16>
    %18 = vector.shape_cast %17 : vector<8x8x128xbf16> to vector<64x128xbf16>
    %c2 = arith.constant 2 : index
    %c0_23 = arith.constant 0 : index
    %c0_24 = arith.constant 0 : index
    %19 = vector.load %arg2[%c2, %c0_23, %c0_24] : memref<4x128x128xbf16, #tpu.memory_space<vmem>>, vector<1x128x128xbf16>
    %20 = vector.shape_cast %19 : vector<1x128x128xbf16> to vector<128x128xbf16>
    %cst_25 = arith.constant dense<0.000000e+00> : vector<64x128xf32>
    %21 = tpu.matmul %18, %20, %cst_25 {dimension_numbers = #tpu.dot_dimension_numbers<[1], [0], [0], [1], [0, 0, 1, 1], [], []>} : vector<64x128xbf16>, vector<128x128xbf16>, vector<64x128xf32> -> vector<64x128xf32>
    %c0_26 = arith.constant 0 : index
    %c0_27 = arith.constant 0 : index
    %22 = vector.load %arg5[%c0_26, %c0_27] : memref<64x128xf32, #tpu.memory_space<vmem>>, vector<64x128xf32>
    %23 = arith.addf %22, %21 : vector<64x128xf32>
    %c0_28 = arith.constant 0 : index
    %c0_29 = arith.constant 0 : index
    %24 = vector.load %arg5[%c0_28, %c0_29] : memref<64x128xf32, #tpu.memory_space<vmem>>, vector<64x128xf32>
    tpu.vector_store %arg5[%c0_28, %c0_29], %23 {strides = array<i32>} : memref<64x128xf32, #tpu.memory_space<vmem>>, vector<64x128xf32>,
    %c0_30 = arith.constant 0 : index
    %c1_31 = arith.constant 1 : index
    %c1_32 = arith.constant 1 : index
    %c0_33 = arith.constant 0 : index
    %25 = vector.load %arg1[%c0_30, %c1_31, %c1_32, %c0_33] : memref<1x9x9x128xbf16, #tpu.memory_space<vmem>>, vector<1x8x8x128xbf16>
    %26 = vector.shape_cast %25 : vector<1x8x8x128xbf16> to vector<8x8x128xbf16>
    %27 = vector.shape_cast %26 : vector<8x8x128xbf16> to vector<64x128xbf16>
    %c3 = arith.constant 3 : index
    %c0_34 = arith.constant 0 : index
    %c0_35 = arith.constant 0 : index
    %28 = vector.load %arg2[%c3, %c0_34, %c0_35] : memref<4x128x128xbf16, #tpu.memory_space<vmem>>, vector<1x128x128xbf16>
    %29 = vector.shape_cast %28 : vector<1x128x128xbf16> to vector<128x128xbf16>
    %cst_36 = arith.constant dense<0.000000e+00> : vector<64x128xf32>
    %30 = tpu.matmul %27, %29, %cst_36 {dimension_numbers = #tpu.dot_dimension_numbers<[1], [0], [0], [1], [0, 0, 1, 1], [], []>} : vector<64x128xbf16>, vector<128x128xbf16>, vector<64x128xf32> -> vector<64x128xf32>
    %c0_37 = arith.constant 0 : index
    %c0_38 = arith.constant 0 : index
    %31 = vector.load %arg5[%c0_37, %c0_38] : memref<64x128xf32, #tpu.memory_space<vmem>>, vector<64x128xf32>
    %32 = arith.addf %31, %30 : vector<64x128xf32>
    %c0_39 = arith.constant 0 : index
    %c0_40 = arith.constant 0 : index
    %33 = vector.load %arg5[%c0_39, %c0_40] : memref<64x128xf32, #tpu.memory_space<vmem>>, vector<64x128xf32>
    tpu.vector_store %arg5[%c0_39, %c0_40], %32 {strides = array<i32>} : memref<64x128xf32, #tpu.memory_space<vmem>>, vector<64x128xf32>,
    %c0_41 = arith.constant 0 : index
    %c0_42 = arith.constant 0 : index
    %34 = vector.load %arg5[%c0_41, %c0_42] : memref<64x128xf32, #tpu.memory_space<vmem>>, vector<64x128xf32>
    %c0_43 = arith.constant 0 : index
    %c0_44 = arith.constant 0 : index
    %35 = vector.load %arg3[%c0_43, %c0_44] : memref<1x128xf32, #tpu.memory_space<vmem>>, vector<1x128xf32>
    %36 = vector.broadcast %35 : vector<1x128xf32> to vector<64x128xf32>
    %37 = arith.addf %34, %36 : vector<64x128xf32>
    %cst_45 = arith.constant dense<0.000000e+00> : vector<128xf32>
    %38 = vector.multi_reduction <add>, %37, %cst_45 [0] : vector<64x128xf32> to vector<128xf32>
    %39 = vector.shape_cast %38 : vector<128xf32> to vector<1x128xf32>
    %40 = arith.mulf %37, %37 : vector<64x128xf32>
    %cst_46 = arith.constant dense<0.000000e+00> : vector<128xf32>
    %41 = vector.multi_reduction <add>, %40, %cst_46 [0] : vector<64x128xf32> to vector<128xf32>
    %42 = vector.shape_cast %41 : vector<128xf32> to vector<1x128xf32>
    %cst_47 = arith.constant 1.562500e-02 : f32
    %43 = vector.broadcast %cst_47 : f32 to vector<1x128xf32>
    %44 = arith.mulf %39, %43 : vector<1x128xf32>
    %cst_48 = arith.constant 1.562500e-02 : f32
    %45 = vector.broadcast %cst_48 : f32 to vector<1x128xf32>
    %46 = arith.mulf %42, %45 : vector<1x128xf32>
    %47 = arith.mulf %44, %44 : vector<1x128xf32>
    %48 = arith.subf %46, %47 : vector<1x128xf32>
    %cst_49 = arith.constant 0.000000e+00 : f32
    %49 = vector.broadcast %cst_49 : f32 to vector<1x128xf32>
    %50 = arith.maximumf %48, %49 : vector<1x128xf32>
    %51 = vector.broadcast %44 : vector<1x128xf32> to vector<64x128xf32>
    %52 = arith.subf %37, %51 : vector<64x128xf32>
    %cst_50 = arith.constant 9.99999974E-6 : f32
    %53 = vector.broadcast %cst_50 : f32 to vector<1x128xf32>
    %54 = arith.addf %50, %53 : vector<1x128xf32>
    %55 = math.rsqrt %54 : vector<1x128xf32>
    %56 = vector.broadcast %55 : vector<1x128xf32> to vector<64x128xf32>
    %57 = arith.mulf %52, %56 : vector<64x128xf32>
    %cst_51 = arith.constant 2.000000e-01 : f32
    %58 = vector.broadcast %cst_51 : f32 to vector<64x128xf32>
    %59 = arith.mulf %58, %57 : vector<64x128xf32>
    %60 = arith.maximumf %57, %59 : vector<64x128xf32>
    %61 = arith.truncf %60 : vector<64x128xf32> to vector<64x128xbf16>
    %c0_52 = arith.constant 0 : index
    %c0_53 = arith.constant 0 : index
    %c0_54 = arith.constant 0 : index
    %62 = vector.load %arg4[%c0_52, %c0_53, %c0_54] : memref<1x64x128xbf16, #tpu.memory_space<vmem>>, vector<1x64x128xbf16>
    %63 = vector.shape_cast %62 : vector<1x64x128xbf16> to vector<64x128xbf16>
    %64 = vector.shape_cast %61 : vector<64x128xbf16> to vector<1x64x128xbf16>
    tpu.vector_store %arg4[%c0_52, %c0_53, %c0_54], %64 {strides = array<i32>} : memref<1x64x128xbf16, #tpu.memory_space<vmem>>, vector<1x64x128xbf16>,
    return
  }
  func.func @transform_0(%arg0: i32) -> (i32, i32, i32, i32) {
    %c0_i32 = arith.constant 0 : i32
    %c0_i32_0 = arith.constant 0 : i32
    %c0_i32_1 = arith.constant 0 : i32
    %c0_i32_2 = arith.constant 0 : i32
    return %arg0, %c0_i32, %c0_i32_0, %c0_i32_1 : i32, i32, i32, i32
  }
  func.func @transform_1(%arg0: i32) -> (i32, i32, i32) {
    %c0_i32 = arith.constant 0 : i32
    %c0_i32_0 = arith.constant 0 : i32
    %c0_i32_1 = arith.constant 0 : i32
    %c0_i32_2 = arith.constant 0 : i32
    return %c0_i32, %c0_i32_0, %c0_i32_1 : i32, i32, i32
  }
  func.func @transform_2(%arg0: i32) -> (i32, i32) {
    %c0_i32 = arith.constant 0 : i32
    %c0_i32_0 = arith.constant 0 : i32
    %c0_i32_1 = arith.constant 0 : i32
    return %c0_i32, %c0_i32_0 : i32, i32
  }
  func.func @transform_3(%arg0: i32) -> (i32, i32, i32) {
    %c0_i32 = arith.constant 0 : i32
    %c0_i32_0 = arith.constant 0 : i32
    %c0_i32_1 = arith.constant 0 : i32
    return %arg0, %c0_i32, %c0_i32_0 : i32, i32, i32
  }
}

module attributes {stable_mosaic.version = 11 : i64} {
  func.func @kernel(%arg0: i32, %arg1: memref<1x10x10x128xbf16, #tpu.memory_space<vmem>>, %arg2: memref<9x128x128xbf16, #tpu.memory_space<vmem>>, %arg3: memref<1x128xf32, #tpu.memory_space<vmem>>, %arg4: memref<1x64x128xbf16, #tpu.memory_space<vmem>>, %arg5: memref<64x128xf32, #tpu.memory_space<vmem>>) attributes {dimension_semantics = [#tpu.dimension_semantics<parallel>], iteration_bounds = array<i64: 2>, scalar_prefetch = 0 : i64, scratch_operands = 1 : i64, tpu.core_type = #tpu.core_type<tc>, window_params = [{transform_indices = @transform_0, window_bounds = array<i64: 1, 10, 10, 128>}, {pipeline_mode = #tpu.pipeline_mode<synchronous>, transform_indices = @transform_1, window_bounds = array<i64: 9, 128, 128>}, {pipeline_mode = #tpu.pipeline_mode<synchronous>, transform_indices = @transform_2, window_bounds = array<i64: 1, 128>}, {transform_indices = @transform_3, window_bounds = array<i64: 1, 64, 128>}]} {
    %c0 = arith.constant 0 : index
    %c0_0 = arith.constant 0 : index
    %c0_1 = arith.constant 0 : index
    %c0_2 = arith.constant 0 : index
    %0 = vector.load %arg1[%c0, %c0_0, %c0_1, %c0_2] : memref<1x10x10x128xbf16, #tpu.memory_space<vmem>>, vector<1x8x8x128xbf16>
    %1 = vector.shape_cast %0 : vector<1x8x8x128xbf16> to vector<8x8x128xbf16>
    %2 = vector.shape_cast %1 : vector<8x8x128xbf16> to vector<64x128xbf16>
    %c0_3 = arith.constant 0 : index
    %c0_4 = arith.constant 0 : index
    %c0_5 = arith.constant 0 : index
    %3 = vector.load %arg2[%c0_3, %c0_4, %c0_5] : memref<9x128x128xbf16, #tpu.memory_space<vmem>>, vector<1x128x128xbf16>
    %4 = vector.shape_cast %3 : vector<1x128x128xbf16> to vector<128x128xbf16>
    %cst = arith.constant dense<0.000000e+00> : vector<64x128xf32>
    %5 = tpu.matmul %2, %4, %cst {dimension_numbers = #tpu.dot_dimension_numbers<[1], [0], [0], [1], [0, 0, 1, 1], [], []>} : vector<64x128xbf16>, vector<128x128xbf16>, vector<64x128xf32> -> vector<64x128xf32>
    %c0_6 = arith.constant 0 : index
    %c0_7 = arith.constant 0 : index
    %6 = vector.load %arg5[%c0_6, %c0_7] : memref<64x128xf32, #tpu.memory_space<vmem>>, vector<64x128xf32>
    tpu.vector_store %arg5[%c0_6, %c0_7], %5 {strides = array<i32>} : memref<64x128xf32, #tpu.memory_space<vmem>>, vector<64x128xf32>,
    %c0_8 = arith.constant 0 : index
    %c0_9 = arith.constant 0 : index
    %c1 = arith.constant 1 : index
    %c0_10 = arith.constant 0 : index
    %7 = vector.load %arg1[%c0_8, %c0_9, %c1, %c0_10] : memref<1x10x10x128xbf16, #tpu.memory_space<vmem>>, vector<1x8x8x128xbf16>
    %8 = vector.shape_cast %7 : vector<1x8x8x128xbf16> to vector<8x8x128xbf16>
    %9 = vector.shape_cast %8 : vector<8x8x128xbf16> to vector<64x128xbf16>
    %c1_11 = arith.constant 1 : index
    %c0_12 = arith.constant 0 : index
    %c0_13 = arith.constant 0 : index
    %10 = vector.load %arg2[%c1_11, %c0_12, %c0_13] : memref<9x128x128xbf16, #tpu.memory_space<vmem>>, vector<1x128x128xbf16>
    %11 = vector.shape_cast %10 : vector<1x128x128xbf16> to vector<128x128xbf16>
    %cst_14 = arith.constant dense<0.000000e+00> : vector<64x128xf32>
    %12 = tpu.matmul %9, %11, %cst_14 {dimension_numbers = #tpu.dot_dimension_numbers<[1], [0], [0], [1], [0, 0, 1, 1], [], []>} : vector<64x128xbf16>, vector<128x128xbf16>, vector<64x128xf32> -> vector<64x128xf32>
    %c0_15 = arith.constant 0 : index
    %c0_16 = arith.constant 0 : index
    %13 = vector.load %arg5[%c0_15, %c0_16] : memref<64x128xf32, #tpu.memory_space<vmem>>, vector<64x128xf32>
    %14 = arith.addf %13, %12 : vector<64x128xf32>
    %c0_17 = arith.constant 0 : index
    %c0_18 = arith.constant 0 : index
    %15 = vector.load %arg5[%c0_17, %c0_18] : memref<64x128xf32, #tpu.memory_space<vmem>>, vector<64x128xf32>
    tpu.vector_store %arg5[%c0_17, %c0_18], %14 {strides = array<i32>} : memref<64x128xf32, #tpu.memory_space<vmem>>, vector<64x128xf32>,
    %c0_19 = arith.constant 0 : index
    %c0_20 = arith.constant 0 : index
    %c2 = arith.constant 2 : index
    %c0_21 = arith.constant 0 : index
    %16 = vector.load %arg1[%c0_19, %c0_20, %c2, %c0_21] : memref<1x10x10x128xbf16, #tpu.memory_space<vmem>>, vector<1x8x8x128xbf16>
    %17 = vector.shape_cast %16 : vector<1x8x8x128xbf16> to vector<8x8x128xbf16>
    %18 = vector.shape_cast %17 : vector<8x8x128xbf16> to vector<64x128xbf16>
    %c2_22 = arith.constant 2 : index
    %c0_23 = arith.constant 0 : index
    %c0_24 = arith.constant 0 : index
    %19 = vector.load %arg2[%c2_22, %c0_23, %c0_24] : memref<9x128x128xbf16, #tpu.memory_space<vmem>>, vector<1x128x128xbf16>
    %20 = vector.shape_cast %19 : vector<1x128x128xbf16> to vector<128x128xbf16>
    %cst_25 = arith.constant dense<0.000000e+00> : vector<64x128xf32>
    %21 = tpu.matmul %18, %20, %cst_25 {dimension_numbers = #tpu.dot_dimension_numbers<[1], [0], [0], [1], [0, 0, 1, 1], [], []>} : vector<64x128xbf16>, vector<128x128xbf16>, vector<64x128xf32> -> vector<64x128xf32>
    %c0_26 = arith.constant 0 : index
    %c0_27 = arith.constant 0 : index
    %22 = vector.load %arg5[%c0_26, %c0_27] : memref<64x128xf32, #tpu.memory_space<vmem>>, vector<64x128xf32>
    %23 = arith.addf %22, %21 : vector<64x128xf32>
    %c0_28 = arith.constant 0 : index
    %c0_29 = arith.constant 0 : index
    %24 = vector.load %arg5[%c0_28, %c0_29] : memref<64x128xf32, #tpu.memory_space<vmem>>, vector<64x128xf32>
    tpu.vector_store %arg5[%c0_28, %c0_29], %23 {strides = array<i32>} : memref<64x128xf32, #tpu.memory_space<vmem>>, vector<64x128xf32>,
    %c0_30 = arith.constant 0 : index
    %c1_31 = arith.constant 1 : index
    %c0_32 = arith.constant 0 : index
    %c0_33 = arith.constant 0 : index
    %25 = vector.load %arg1[%c0_30, %c1_31, %c0_32, %c0_33] : memref<1x10x10x128xbf16, #tpu.memory_space<vmem>>, vector<1x8x8x128xbf16>
    %26 = vector.shape_cast %25 : vector<1x8x8x128xbf16> to vector<8x8x128xbf16>
    %27 = vector.shape_cast %26 : vector<8x8x128xbf16> to vector<64x128xbf16>
    %c3 = arith.constant 3 : index
    %c0_34 = arith.constant 0 : index
    %c0_35 = arith.constant 0 : index
    %28 = vector.load %arg2[%c3, %c0_34, %c0_35] : memref<9x128x128xbf16, #tpu.memory_space<vmem>>, vector<1x128x128xbf16>
    %29 = vector.shape_cast %28 : vector<1x128x128xbf16> to vector<128x128xbf16>
    %cst_36 = arith.constant dense<0.000000e+00> : vector<64x128xf32>
    %30 = tpu.matmul %27, %29, %cst_36 {dimension_numbers = #tpu.dot_dimension_numbers<[1], [0], [0], [1], [0, 0, 1, 1], [], []>} : vector<64x128xbf16>, vector<128x128xbf16>, vector<64x128xf32> -> vector<64x128xf32>
    %c0_37 = arith.constant 0 : index
    %c0_38 = arith.constant 0 : index
    %31 = vector.load %arg5[%c0_37, %c0_38] : memref<64x128xf32, #tpu.memory_space<vmem>>, vector<64x128xf32>
    %32 = arith.addf %31, %30 : vector<64x128xf32>
    %c0_39 = arith.constant 0 : index
    %c0_40 = arith.constant 0 : index
    %33 = vector.load %arg5[%c0_39, %c0_40] : memref<64x128xf32, #tpu.memory_space<vmem>>, vector<64x128xf32>
    tpu.vector_store %arg5[%c0_39, %c0_40], %32 {strides = array<i32>} : memref<64x128xf32, #tpu.memory_space<vmem>>, vector<64x128xf32>,
    %c0_41 = arith.constant 0 : index
    %c1_42 = arith.constant 1 : index
    %c1_43 = arith.constant 1 : index
    %c0_44 = arith.constant 0 : index
    %34 = vector.load %arg1[%c0_41, %c1_42, %c1_43, %c0_44] : memref<1x10x10x128xbf16, #tpu.memory_space<vmem>>, vector<1x8x8x128xbf16>
    %35 = vector.shape_cast %34 : vector<1x8x8x128xbf16> to vector<8x8x128xbf16>
    %36 = vector.shape_cast %35 : vector<8x8x128xbf16> to vector<64x128xbf16>
    %c4 = arith.constant 4 : index
    %c0_45 = arith.constant 0 : index
    %c0_46 = arith.constant 0 : index
    %37 = vector.load %arg2[%c4, %c0_45, %c0_46] : memref<9x128x128xbf16, #tpu.memory_space<vmem>>, vector<1x128x128xbf16>
    %38 = vector.shape_cast %37 : vector<1x128x128xbf16> to vector<128x128xbf16>
    %cst_47 = arith.constant dense<0.000000e+00> : vector<64x128xf32>
    %39 = tpu.matmul %36, %38, %cst_47 {dimension_numbers = #tpu.dot_dimension_numbers<[1], [0], [0], [1], [0, 0, 1, 1], [], []>} : vector<64x128xbf16>, vector<128x128xbf16>, vector<64x128xf32> -> vector<64x128xf32>
    %c0_48 = arith.constant 0 : index
    %c0_49 = arith.constant 0 : index
    %40 = vector.load %arg5[%c0_48, %c0_49] : memref<64x128xf32, #tpu.memory_space<vmem>>, vector<64x128xf32>
    %41 = arith.addf %40, %39 : vector<64x128xf32>
    %c0_50 = arith.constant 0 : index
    %c0_51 = arith.constant 0 : index
    %42 = vector.load %arg5[%c0_50, %c0_51] : memref<64x128xf32, #tpu.memory_space<vmem>>, vector<64x128xf32>
    tpu.vector_store %arg5[%c0_50, %c0_51], %41 {strides = array<i32>} : memref<64x128xf32, #tpu.memory_space<vmem>>, vector<64x128xf32>,
    %c0_52 = arith.constant 0 : index
    %c1_53 = arith.constant 1 : index
    %c2_54 = arith.constant 2 : index
    %c0_55 = arith.constant 0 : index
    %43 = vector.load %arg1[%c0_52, %c1_53, %c2_54, %c0_55] : memref<1x10x10x128xbf16, #tpu.memory_space<vmem>>, vector<1x8x8x128xbf16>
    %44 = vector.shape_cast %43 : vector<1x8x8x128xbf16> to vector<8x8x128xbf16>
    %45 = vector.shape_cast %44 : vector<8x8x128xbf16> to vector<64x128xbf16>
    %c5 = arith.constant 5 : index
    %c0_56 = arith.constant 0 : index
    %c0_57 = arith.constant 0 : index
    %46 = vector.load %arg2[%c5, %c0_56, %c0_57] : memref<9x128x128xbf16, #tpu.memory_space<vmem>>, vector<1x128x128xbf16>
    %47 = vector.shape_cast %46 : vector<1x128x128xbf16> to vector<128x128xbf16>
    %cst_58 = arith.constant dense<0.000000e+00> : vector<64x128xf32>
    %48 = tpu.matmul %45, %47, %cst_58 {dimension_numbers = #tpu.dot_dimension_numbers<[1], [0], [0], [1], [0, 0, 1, 1], [], []>} : vector<64x128xbf16>, vector<128x128xbf16>, vector<64x128xf32> -> vector<64x128xf32>
    %c0_59 = arith.constant 0 : index
    %c0_60 = arith.constant 0 : index
    %49 = vector.load %arg5[%c0_59, %c0_60] : memref<64x128xf32, #tpu.memory_space<vmem>>, vector<64x128xf32>
    %50 = arith.addf %49, %48 : vector<64x128xf32>
    %c0_61 = arith.constant 0 : index
    %c0_62 = arith.constant 0 : index
    %51 = vector.load %arg5[%c0_61, %c0_62] : memref<64x128xf32, #tpu.memory_space<vmem>>, vector<64x128xf32>
    tpu.vector_store %arg5[%c0_61, %c0_62], %50 {strides = array<i32>} : memref<64x128xf32, #tpu.memory_space<vmem>>, vector<64x128xf32>,
    %c0_63 = arith.constant 0 : index
    %c2_64 = arith.constant 2 : index
    %c0_65 = arith.constant 0 : index
    %c0_66 = arith.constant 0 : index
    %52 = vector.load %arg1[%c0_63, %c2_64, %c0_65, %c0_66] : memref<1x10x10x128xbf16, #tpu.memory_space<vmem>>, vector<1x8x8x128xbf16>
    %53 = vector.shape_cast %52 : vector<1x8x8x128xbf16> to vector<8x8x128xbf16>
    %54 = vector.shape_cast %53 : vector<8x8x128xbf16> to vector<64x128xbf16>
    %c6 = arith.constant 6 : index
    %c0_67 = arith.constant 0 : index
    %c0_68 = arith.constant 0 : index
    %55 = vector.load %arg2[%c6, %c0_67, %c0_68] : memref<9x128x128xbf16, #tpu.memory_space<vmem>>, vector<1x128x128xbf16>
    %56 = vector.shape_cast %55 : vector<1x128x128xbf16> to vector<128x128xbf16>
    %cst_69 = arith.constant dense<0.000000e+00> : vector<64x128xf32>
    %57 = tpu.matmul %54, %56, %cst_69 {dimension_numbers = #tpu.dot_dimension_numbers<[1], [0], [0], [1], [0, 0, 1, 1], [], []>} : vector<64x128xbf16>, vector<128x128xbf16>, vector<64x128xf32> -> vector<64x128xf32>
    %c0_70 = arith.constant 0 : index
    %c0_71 = arith.constant 0 : index
    %58 = vector.load %arg5[%c0_70, %c0_71] : memref<64x128xf32, #tpu.memory_space<vmem>>, vector<64x128xf32>
    %59 = arith.addf %58, %57 : vector<64x128xf32>
    %c0_72 = arith.constant 0 : index
    %c0_73 = arith.constant 0 : index
    %60 = vector.load %arg5[%c0_72, %c0_73] : memref<64x128xf32, #tpu.memory_space<vmem>>, vector<64x128xf32>
    tpu.vector_store %arg5[%c0_72, %c0_73], %59 {strides = array<i32>} : memref<64x128xf32, #tpu.memory_space<vmem>>, vector<64x128xf32>,
    %c0_74 = arith.constant 0 : index
    %c2_75 = arith.constant 2 : index
    %c1_76 = arith.constant 1 : index
    %c0_77 = arith.constant 0 : index
    %61 = vector.load %arg1[%c0_74, %c2_75, %c1_76, %c0_77] : memref<1x10x10x128xbf16, #tpu.memory_space<vmem>>, vector<1x8x8x128xbf16>
    %62 = vector.shape_cast %61 : vector<1x8x8x128xbf16> to vector<8x8x128xbf16>
    %63 = vector.shape_cast %62 : vector<8x8x128xbf16> to vector<64x128xbf16>
    %c7 = arith.constant 7 : index
    %c0_78 = arith.constant 0 : index
    %c0_79 = arith.constant 0 : index
    %64 = vector.load %arg2[%c7, %c0_78, %c0_79] : memref<9x128x128xbf16, #tpu.memory_space<vmem>>, vector<1x128x128xbf16>
    %65 = vector.shape_cast %64 : vector<1x128x128xbf16> to vector<128x128xbf16>
    %cst_80 = arith.constant dense<0.000000e+00> : vector<64x128xf32>
    %66 = tpu.matmul %63, %65, %cst_80 {dimension_numbers = #tpu.dot_dimension_numbers<[1], [0], [0], [1], [0, 0, 1, 1], [], []>} : vector<64x128xbf16>, vector<128x128xbf16>, vector<64x128xf32> -> vector<64x128xf32>
    %c0_81 = arith.constant 0 : index
    %c0_82 = arith.constant 0 : index
    %67 = vector.load %arg5[%c0_81, %c0_82] : memref<64x128xf32, #tpu.memory_space<vmem>>, vector<64x128xf32>
    %68 = arith.addf %67, %66 : vector<64x128xf32>
    %c0_83 = arith.constant 0 : index
    %c0_84 = arith.constant 0 : index
    %69 = vector.load %arg5[%c0_83, %c0_84] : memref<64x128xf32, #tpu.memory_space<vmem>>, vector<64x128xf32>
    tpu.vector_store %arg5[%c0_83, %c0_84], %68 {strides = array<i32>} : memref<64x128xf32, #tpu.memory_space<vmem>>, vector<64x128xf32>,
    %c0_85 = arith.constant 0 : index
    %c2_86 = arith.constant 2 : index
    %c2_87 = arith.constant 2 : index
    %c0_88 = arith.constant 0 : index
    %70 = vector.load %arg1[%c0_85, %c2_86, %c2_87, %c0_88] : memref<1x10x10x128xbf16, #tpu.memory_space<vmem>>, vector<1x8x8x128xbf16>
    %71 = vector.shape_cast %70 : vector<1x8x8x128xbf16> to vector<8x8x128xbf16>
    %72 = vector.shape_cast %71 : vector<8x8x128xbf16> to vector<64x128xbf16>
    %c8 = arith.constant 8 : index
    %c0_89 = arith.constant 0 : index
    %c0_90 = arith.constant 0 : index
    %73 = vector.load %arg2[%c8, %c0_89, %c0_90] : memref<9x128x128xbf16, #tpu.memory_space<vmem>>, vector<1x128x128xbf16>
    %74 = vector.shape_cast %73 : vector<1x128x128xbf16> to vector<128x128xbf16>
    %cst_91 = arith.constant dense<0.000000e+00> : vector<64x128xf32>
    %75 = tpu.matmul %72, %74, %cst_91 {dimension_numbers = #tpu.dot_dimension_numbers<[1], [0], [0], [1], [0, 0, 1, 1], [], []>} : vector<64x128xbf16>, vector<128x128xbf16>, vector<64x128xf32> -> vector<64x128xf32>
    %c0_92 = arith.constant 0 : index
    %c0_93 = arith.constant 0 : index
    %76 = vector.load %arg5[%c0_92, %c0_93] : memref<64x128xf32, #tpu.memory_space<vmem>>, vector<64x128xf32>
    %77 = arith.addf %76, %75 : vector<64x128xf32>
    %c0_94 = arith.constant 0 : index
    %c0_95 = arith.constant 0 : index
    %78 = vector.load %arg5[%c0_94, %c0_95] : memref<64x128xf32, #tpu.memory_space<vmem>>, vector<64x128xf32>
    tpu.vector_store %arg5[%c0_94, %c0_95], %77 {strides = array<i32>} : memref<64x128xf32, #tpu.memory_space<vmem>>, vector<64x128xf32>,
    %c0_96 = arith.constant 0 : index
    %c0_97 = arith.constant 0 : index
    %79 = vector.load %arg5[%c0_96, %c0_97] : memref<64x128xf32, #tpu.memory_space<vmem>>, vector<64x128xf32>
    %c0_98 = arith.constant 0 : index
    %c0_99 = arith.constant 0 : index
    %80 = vector.load %arg3[%c0_98, %c0_99] : memref<1x128xf32, #tpu.memory_space<vmem>>, vector<1x128xf32>
    %81 = vector.broadcast %80 : vector<1x128xf32> to vector<64x128xf32>
    %82 = arith.addf %79, %81 : vector<64x128xf32>
    %cst_100 = arith.constant dense<0.000000e+00> : vector<128xf32>
    %83 = vector.multi_reduction <add>, %82, %cst_100 [0] : vector<64x128xf32> to vector<128xf32>
    %84 = vector.shape_cast %83 : vector<128xf32> to vector<1x128xf32>
    %85 = arith.mulf %82, %82 : vector<64x128xf32>
    %cst_101 = arith.constant dense<0.000000e+00> : vector<128xf32>
    %86 = vector.multi_reduction <add>, %85, %cst_101 [0] : vector<64x128xf32> to vector<128xf32>
    %87 = vector.shape_cast %86 : vector<128xf32> to vector<1x128xf32>
    %cst_102 = arith.constant 1.562500e-02 : f32
    %88 = vector.broadcast %cst_102 : f32 to vector<1x128xf32>
    %89 = arith.mulf %84, %88 : vector<1x128xf32>
    %cst_103 = arith.constant 1.562500e-02 : f32
    %90 = vector.broadcast %cst_103 : f32 to vector<1x128xf32>
    %91 = arith.mulf %87, %90 : vector<1x128xf32>
    %92 = arith.mulf %89, %89 : vector<1x128xf32>
    %93 = arith.subf %91, %92 : vector<1x128xf32>
    %cst_104 = arith.constant 0.000000e+00 : f32
    %94 = vector.broadcast %cst_104 : f32 to vector<1x128xf32>
    %95 = arith.maximumf %93, %94 : vector<1x128xf32>
    %96 = vector.broadcast %89 : vector<1x128xf32> to vector<64x128xf32>
    %97 = arith.subf %82, %96 : vector<64x128xf32>
    %cst_105 = arith.constant 9.99999974E-6 : f32
    %98 = vector.broadcast %cst_105 : f32 to vector<1x128xf32>
    %99 = arith.addf %95, %98 : vector<1x128xf32>
    %100 = math.rsqrt %99 : vector<1x128xf32>
    %101 = vector.broadcast %100 : vector<1x128xf32> to vector<64x128xf32>
    %102 = arith.mulf %97, %101 : vector<64x128xf32>
    %cst_106 = arith.constant 2.000000e-01 : f32
    %103 = vector.broadcast %cst_106 : f32 to vector<64x128xf32>
    %104 = arith.mulf %103, %102 : vector<64x128xf32>
    %105 = arith.maximumf %102, %104 : vector<64x128xf32>
    %106 = arith.truncf %105 : vector<64x128xf32> to vector<64x128xbf16>
    %c0_107 = arith.constant 0 : index
    %c0_108 = arith.constant 0 : index
    %c0_109 = arith.constant 0 : index
    %107 = vector.load %arg4[%c0_107, %c0_108, %c0_109] : memref<1x64x128xbf16, #tpu.memory_space<vmem>>, vector<1x64x128xbf16>
    %108 = vector.shape_cast %107 : vector<1x64x128xbf16> to vector<64x128xbf16>
    %109 = vector.shape_cast %106 : vector<64x128xbf16> to vector<1x64x128xbf16>
    tpu.vector_store %arg4[%c0_107, %c0_108, %c0_109], %109 {strides = array<i32>} : memref<1x64x128xbf16, #tpu.memory_space<vmem>>, vector<1x64x128xbf16>,
    return
  }
  func.func @transform_0(%arg0: i32) -> (i32, i32, i32, i32) {
    %c0_i32 = arith.constant 0 : i32
    %c0_i32_0 = arith.constant 0 : i32
    %c0_i32_1 = arith.constant 0 : i32
    %c0_i32_2 = arith.constant 0 : i32
    return %arg0, %c0_i32, %c0_i32_0, %c0_i32_1 : i32, i32, i32, i32
  }
  func.func @transform_1(%arg0: i32) -> (i32, i32, i32) {
    %c0_i32 = arith.constant 0 : i32
    %c0_i32_0 = arith.constant 0 : i32
    %c0_i32_1 = arith.constant 0 : i32
    %c0_i32_2 = arith.constant 0 : i32
    return %c0_i32, %c0_i32_0, %c0_i32_1 : i32, i32, i32
  }
  func.func @transform_2(%arg0: i32) -> (i32, i32) {
    %c0_i32 = arith.constant 0 : i32
    %c0_i32_0 = arith.constant 0 : i32
    %c0_i32_1 = arith.constant 0 : i32
    return %c0_i32, %c0_i32_0 : i32, i32
  }
  func.func @transform_3(%arg0: i32) -> (i32, i32, i32) {
    %c0_i32 = arith.constant 0 : i32
    %c0_i32_0 = arith.constant 0 : i32
    %c0_i32_1 = arith.constant 0 : i32
    return %arg0, %c0_i32, %c0_i32_0 : i32, i32, i32
  }
}

</mosaic_0001>

<bundles_post_ra>
// kernel: down_conv_forward.2
= control target key start
LH: loop header
LB: loop body
LE: loop exit
PB: predicated region body
PF: predicated region fallthrough
CT: control target
= control target key end

     0   :  { %s1712_s12 = smov 0   ;;  %s1936_s0 = inlined_call_operand.vmem [shape: bf16[2,9,9,128], index: 0, kind: input, shape index: {}]   ;;  %s1937_s1 = inlined_call_operand.vmem [shape: bf16[4,128,128], index: 1, kind: input, shape index: {}]   ;;  %s1938_s2 = inlined_call_operand.vmem [shape: f32[1,128], index: 2, kind: input, shape index: {}]   ;;  %s1939_s3 = inlined_call_operand.vmem [shape: bf16[2,64,128], index: 3, kind: output, shape index: {}]  }
   0x1 LB: > { %s1318_s13 = sadd.s32 4294967295, %s1690_s12   ;;  %p1322_p0 = scmp.ge.s32.totalorder %s1690_s12, 1  ;;  %s1690_s12 = sphi %s1712_s12, %s13_s12  }
   0x2   : > { %p137_p1 = scmp.lt.s32.totalorder %s1690_s12, 3 }
   0x4   : > { %p138_p2 = pnand %p1322_p0, %p137_p1 }
   0x5   : > { %p161_p3 = scmp.lt.s32.totalorder (!%p138_p2), %s1318_s13, 1 }
   0x6   : > { %141 = sbr.rel (%p138_p2) target bundleno = 342 (0x156), region = 32 }
   0xb   : > { %v1642_v0 = vld [vmem:[%s1937_s1 + $0x38] sm:$0xff]   ;;  %v1644_v2 = vld [vmem:[%s1937_s1 + $0x30] sm:$0xff]   ;;  %v1646_v4 = vld [vmem:[%s1937_s1 + $0x28] sm:$0xff]   ;;  %s1943_s13 = smov (!%p161_p3, %s1318_s13), 1  ;;  %vm357_vm0 = vsmask.f32 3328 }
   0xc   : > { %v1643_v1 = vld [vmem:[%s1937_s1 + $0x78] sm:$0xff]   ;;  %1537 = vmatprep.subr.bf16.mxu0 %v1642_v0  ;;  %v1645_v3 = vld [vmem:[%s1937_s1 + $0x70] sm:$0xff]   ;;  %v1647_v5 = vld [vmem:[%s1937_s1 + $0x68] sm:$0xff]   ;;  %s1633_s30 = smul.u32 72, %s1943_s13  ;;  %vm358_vm1 = vsmask.f32 7440 }
   0xd   : > { %1561 = vmatprep.subr.bf16.mxu1 %v1643_v1  ;;  %1538 = vmatpush3.bf16.msra.mxu0 %v1642_v0  ;;  %v1648_v6 = vld [vmem:[%s1937_s1 + $0x20] sm:$0xff]   ;;  %v1650_v8 = vld [vmem:[%s1937_s1 + $0x18] sm:$0xff]   ;;  %v1652_v10 = vld [vmem:[%s1937_s1 + $0x10] sm:$0xff]   ;;  %s1457_s7 = sshll.u32 %s1943_s13, 5 }
   0xe   : > { %1562 = vmatpush3.bf16.msra.mxu1 %v1643_v1  ;;  %1539 = vmatprep.subr.bf16.mxu0 %v1644_v2  ;;  %v1649_v7 = vld [vmem:[%s1937_s1 + $0x60] sm:$0xff]   ;;  %v1651_v9 = vld [vmem:[%s1937_s1 + $0x58] sm:$0xff]   ;;  %s1759_s14 = scalar_lea.vmem %s1936_s0, %s1633_s30  ;;  %v1653_v11 = vld [vmem:[%s1937_s1 + $0x50] sm:$0xff]   ;;  %s170_s10 = scalar_lea.vmem %s1939_s3, %s1457_s7 }
   0xf   : > { %1563 = vmatprep.subr.bf16.mxu1 %v1645_v3  ;;  %v1658_v12 = vld [vmem:[%s1759_s14] ss:$8 sps:$4 sm:$0xff]   ;;  %v342_v14 = vld [vmem:[%s1759_s14 + $0x4] sm:$0x1]  ;;  %v344_v17 = vld [vmem:[%s1759_s14 + $0xc] sm:$0x1] }
  0x10   : > { %v341_v13 = vld [vmem:[%s1759_s14] sm:$0xf]  ;;  %v343_v15 = vld [vmem:[%s1759_s14 + $0x8] sm:$0xf]  ;;  %1553 = vmatprep.mubr.bf16.mxu0 %v1658_v12  ;;  %v370_v21 = vshll.u32 %v342_v14, 16  ;;  %v384_v24 = vshll.u32 %v344_v17, 16  ;;  %vm1784_vm2 = vmor %vm357_vm0, %vm358_vm1 }
  0x11   : > { %1540 = vmatpush3.bf16.msra.mxu0 %v1644_v2  ;;  %v1654_v16 = vld [vmem:[%s1937_s1 + $0x8] sm:$0xff]   ;;  %v361_v19 = vshrl.u32 %v341_v13, 16  ;;  %v364_v20 = vshll.u32 %v341_v13, 16  ;;  %v375_v22 = vshrl.u32 %v343_v15, 16  ;;  %v378_v23 = vshll.u32 %v343_v15, 16  ;;  %v1656_v39 = vld [vmem:[%s1937_s1] sm:$0xff]  }
  0x12   : > { %1564 = vmatpush3.bf16.msra.mxu1 %v1645_v3  ;;  %1541 = vmatprep.subr.bf16.mxu0 %v1646_v4  ;;  %v1655_v18 = vld [vmem:[%s1937_s1 + $0x48] sm:$0xff]   ;;  %v372_v27 = vrot.slane %v370_v21, 5  ;;  %v345_v29 = vld [vmem:[%s1759_s14 + $0x10] sm:$0xf]  ;;  %v386_v31 = vrot.slane %v384_v24, 5  ;;  %v1657_v45 = vld [vmem:[%s1937_s1 + $0x40] sm:$0xff]  }
  0x13   : > { %1565 = vmatprep.subr.bf16.mxu1 %v1647_v5  ;;  %v363_v25 = vrot.slane %v361_v19, 4  ;;  %v366_v26 = vrot.slane %v364_v20, 5  ;;  %v377_v28 = vrot.slane %v375_v22, 4  ;;  %v380_v30 = vrot.slane %v378_v23, 5  ;;  %v346_v32 = vld [vmem:[%s1759_s14 + $0x14] sm:$0x1] }
  0x14   : > { %v347_v33 = vld [vmem:[%s1759_s14 + $0x18] sm:$0xf]  ;;  %v348_v35 = vld [vmem:[%s1759_s14 + $0x1c] sm:$0x1]  ;;  %v389_v36 = vshrl.u32 %v345_v29, 16  ;;  %v392_v37 = vshll.u32 %v345_v29, 16 }
  0x15   : > { %1542 = vmatpush3.bf16.msra.mxu0 %v1646_v4  ;;  %v367_v34 = vor.u32 %v366_v26, %v363_v25  ;;  %v398_v38 = vshll.u32 %v346_v32, 16  ;;  %v381_v41 = vor.u32 %v380_v30, %v377_v28  ;;  %v403_v42 = vshrl.u32 %v347_v33, 16  ;;  %v1659_v56 = vld [vmem:[%s1759_s14 + $0x10] ss:$8 sps:$4 sm:$0xff]   ;;  %v1666_v14 = vld [vmem:[%s1937_s1 + $0xa0] sm:$0xff]  }
  0x16   : > { %1566 = vmatpush3.bf16.msra.mxu1 %v1647_v5  ;;  %1543 = vmatprep.subr.bf16.mxu0 %v1648_v6  ;;  %v406_v43 = vshll.u32 %v347_v33, 16  ;;  %v412_v44 = vshll.u32 %v348_v35, 16  ;;  %v391_v47 = vrot.slane %v389_v36, 4  ;;  %v394_v48 = vrot.slane %v392_v37, 5  ;;  %v1660_v59 = vld [vmem:[%s1937_s1 + $0xb8] sm:$0xff]   ;;  %v1662_v2 = vld [vmem:[%s1937_s1 + $0xb0] sm:$0xff]  }
  0x17   : > { %1567 = vmatprep.subr.bf16.mxu1 %v1649_v7  ;;  %v368_v46 = vrot.slane %v367_v34, 4  ;;  %v382_v49 = vrot.slane %v381_v41, 4  ;;  %v400_v50 = vrot.slane %v398_v38, 5  ;;  %v405_v51 = vrot.slane %v403_v42, 4  ;;  %v1661_v62 = vld [vmem:[%s1937_s1 + $0xf8] sm:$0xff]   ;;  %v1663_v4 = vld [vmem:[%s1937_s1 + $0xf0] sm:$0xff]  }
  0x18   : > { %v408_v52 = vrot.slane %v406_v43, 5  ;;  %v395_v54 = vor.u32 %v394_v48, %v391_v47  ;;  %v414_v58 = vrot.slane %v412_v44, 5  ;;  %v1664_v5 = vld [vmem:[%s1937_s1 + $0xa8] sm:$0xff]   ;;  %v1667_v19 = vld [vmem:[%s1937_s1 + $0xe0] sm:$0xff]   ;;  %v1671_v22 = vld [vmem:[%s1759_s14 + $0x30] ss:$8 sps:$4 sm:$0xff]  }
  0x19   : > { %1544 = vmatpush3.bf16.msra.mxu0 %v1648_v6  ;;  %v373_v53 = vsel %vm1784_vm2, %v368_v46, %v372_v27  ;;  %v387_v55 = vsel %vm1784_vm2, %v382_v49, %v386_v31  ;;  %v1665_v6 = vld [vmem:[%s1937_s1 + $0xe8] sm:$0xff]   ;;  %v353_v27 = vld [vmem:[%s1759_s14 + $0x30] sm:$0xf]  ;;  %v354_v29 = vld [vmem:[%s1759_s14 + $0x34] sm:$0x1] }
  0x1a   : > { %1568 = vmatpush3.bf16.msra.mxu1 %v1649_v7  ;;  %1545 = vmatprep.subr.bf16.mxu0 %v1650_v8  ;;  %v409_v57 = vor.u32 %v408_v52, %v405_v51  ;;  %v1354_v60 = vcombine.low %v373_v53, %v387_v55  ;;  %v396_v61 = vrot.slane %v395_v54, 4  ;;  %v1670_v7 = vld [vmem:[%s1759_s14 + $0x20] ss:$8 sps:$4 sm:$0xff]   ;;  %v355_v30 = vld [vmem:[%s1759_s14 + $0x38] sm:$0xf]  ;;  %v445_v33 = vshrl.u32 %v353_v27, 16 }
  0x1b   : > { %1569 = vmatprep.subr.bf16.mxu1 %v1651_v9  ;;  %v356_v31 = vld [vmem:[%s1759_s14 + $0x3c] sm:$0x1]  ;;  %v448_v34 = vshll.u32 %v353_v27, 16  ;;  %v454_v35 = vshll.u32 %v354_v29, 16  ;;  %v459_v37 = vshrl.u32 %v355_v30, 16  ;;  %v462_v38 = vshll.u32 %v355_v30, 16 }
  0x1c   : > { %v410_v63 = vrot.slane %v409_v57, 4  ;;  %1577 = vmatprep.mubr.bf16.mxu1 %v1354_v60  ;;  %v401_v0 = vsel %vm1784_vm2, %v396_v61, %v400_v50  ;;  %v1668_v41 = vld [vmem:[%s1937_s1 + $0x98] sm:$0xff]   ;;  %v447_v43 = vrot.slane %v445_v33, 4  ;;  %v1678_v60 = vld [vmem:[%s1759_s14 + $0x8] ss:$8 sps:$4 sm:$0xff]  }
  0x1d   : > { %1546 = vmatpush3.bf16.msra.mxu0 %v1650_v8  ;;  %v349_v8 = vld [vmem:[%s1759_s14 + $0x20] sm:$0xf]  ;;  %v450_v44 = vrot.slane %v448_v34, 5  ;;  %v461_v47 = vrot.slane %v459_v37, 4  ;;  %v464_v48 = vrot.slane %v462_v38, 5  ;;  %v456_v51 = vrot.slane %v454_v35, 5 }
  0x1e   : > { %1570 = vmatpush3.bf16.msra.mxu1 %v1651_v9  ;;  %1547 = vmatprep.subr.bf16.mxu0 %v1652_v10  ;;  %v415_v1 = vsel %vm1784_vm2, %v410_v63, %v414_v58  ;;  %v350_v9 = vld [vmem:[%s1759_s14 + $0x24] sm:$0x1]  ;;  %v417_v12 = vshrl.u32 %v349_v8, 16  ;;  %v420_v13 = vshll.u32 %v349_v8, 16  ;;  %v1673_v58 = vld [vmem:[%s1937_s1 + $0xd0] sm:$0xff]  }
  0x1f   : > { %1571 = vmatprep.subr.bf16.mxu1 %v1653_v11  ;;  %v1355_v3 = vcombine.low %v401_v0, %v415_v1  ;;  %v426_v15 = vshll.u32 %v350_v9, 16  ;;  %v451_v50 = vor.u32 %v450_v44, %v447_v43  ;;  %v465_v53 = vor.u32 %v464_v48, %v461_v47  ;;  %v1403_v63 = vld [vmem:[%s1759_s14 + $0xc] sm:$0x1]  ;;  %v1404_v0 = vld [vmem:[%s1759_s14 + $0x10] sm:$0xf] }
  0x20   : > { %v419_v20 = vrot.slane %v417_v12, 4  ;;  %v422_v21 = vrot.slane %v420_v13, 5  ;;  %v860_v8 = vshrl.u32 %v1404_v0, 16  ;;  %v863_v9 = vshll.u32 %v1404_v0, 16  ;;  %v1676_v13 = vld [vmem:[%s1937_s1 + $0x80] sm:$0xff]  }
  0x21   : > { %1548 = vmatpush3.bf16.msra.mxu0 %v1652_v10  ;;  %v351_v10 = vld [vmem:[%s1759_s14 + $0x28] sm:$0xf]  ;;  %v428_v23 = vrot.slane %v426_v15, 5  ;;  %v452_v55 = vrot.slane %v451_v50, 4  ;;  %v466_v57 = vrot.slane %v465_v53, 4 }
  0x22   : > { %1572 = vmatpush3.bf16.msra.mxu1 %v1653_v11  ;;  %1549 = vmatprep.subr.bf16.mxu0 %v1654_v16  ;;  %v352_v11 = vld [vmem:[%s1759_s14 + $0x2c] sm:$0x1]  ;;  %v434_v17 = vshll.u32 %v351_v10, 16  ;;  %v423_v28 = vor.u32 %v422_v21, %v419_v20  ;;  %v862_v15 = vrot.slane %v860_v8, 4  ;;  %v1407_v20 = vld [vmem:[%s1759_s14 + $0x1c] sm:$0x1] }
  0x23   : > { %1573 = vmatprep.subr.bf16.mxu1 %v1655_v18  ;;  %v1408_v21 = vld [vmem:[%s1759_s14 + $0x20] sm:$0xf]  ;;  %v883_v27 = vshll.u32 %v1407_v20, 16  ;;  %v1680_v44 = vld [vmem:[%s1759_s14 + $0x28] ss:$8 sps:$4 sm:$0xff]  }
  0x24   : > { %v436_v25 = vrot.slane %v434_v17, 5  ;;  %v424_v36 = vrot.slane %v423_v28, 4  ;;  %v888_v29 = vshrl.u32 %v1408_v21, 16  ;;  %v891_v30 = vshll.u32 %v1408_v21, 16  ;;  %v1679_v37 = vld [vmem:[%s1759_s14 + $0x18] ss:$8 sps:$4 sm:$0xff]  }
  0x25   : > { %1550 = vmatpush3.bf16.msra.mxu0 %v1654_v16  ;;  %v431_v16 = vshrl.u32 %v351_v10, 16  ;;  %v885_v35 = vrot.slane %v883_v27, 5  ;;  %v1412_v47 = vld [vmem:[%s1759_s14 + $0x30] sm:$0xf]  ;;  %v1413_v50 = vld [vmem:[%s1759_s14 + $0x34] sm:$0x1] }
  0x26   : > { %1574 = vmatpush3.bf16.msra.mxu1 %v1655_v18  ;;  %1551 = vmatprep.subr.bf16.mxu0 %v1656_v39  ;;  %v440_v18 = vshll.u32 %v352_v11, 16  ;;  %v429_v46 = vsel %vm1784_vm2, %v424_v36, %v428_v23  ;;  %v890_v38 = vrot.slane %v888_v29, 4  ;;  %v1681_v21 = vld [vmem:[%s1759_s14 + $0x38] ss:$8 sps:$4 sm:$0xff]  }
  0x27   : > { %1575 = vmatprep.subr.bf16.mxu1 %v1657_v45  ;;  %v433_v24 = vrot.slane %v431_v16, 4  ;;  %v865_v16 = vrot.slane %v863_v9, 5 }
  0x28   : > { %v442_v26 = vrot.slane %v440_v18, 5 }
  0x29   : > { %1552 = vmatpush3.bf16.msra.mxu0 %v1656_v39  ;;  %v437_v32 = vor.u32 %v436_v25, %v433_v24  ;;  %v468_v39 = vshll.u32 %v356_v31, 16  ;;  %v866_v23 = vor.u32 %v865_v16, %v862_v15  ;;  %v1409_v24 = vld [vmem:[%s1759_s14 + $0x24] sm:$0x1] }
  0x2a   : > { %1576 = vmatpush3.bf16.msra.mxu1 %v1657_v45  ;;  %1585 = vmatprep.subr.bf16.mxu0 %v1660_v59  ;;  %v1669_v45 = vld [vmem:[%s1937_s1 + $0xd8] sm:$0xff]   ;;  %v897_v31 = vshll.u32 %v1409_v24, 16 }
  0x2b   : > { %1609 = vmatprep.subr.bf16.mxu1 %v1661_v62  ;;  %v438_v42 = vrot.slane %v437_v32, 4  ;;  %v470_v54 = vrot.slane %v468_v39, 5  ;;  %v867_v32 = vrot.slane %v866_v23, 4  ;;  %v893_v39 = vrot.slane %v891_v30, 5 }
  0x2c   : > { %1554 = vmatmul.mubr.bf16.vlgmr.msra.gmra.mxu0 %v1659_v56  ;;  %v1672_v56 = vld [vmem:[%s1937_s1 + $0x90] sm:$0xff]  }
  0x2d   : > { %1578 = vmatmul.mubr.bf16.vlgmr.msra.gmra.mxu1 %v1355_v3  ;;  %1586 = vmatpush3.bf16.msra.mxu0 %v1660_v59  ;;  %v443_v49 = vsel %vm1784_vm2, %v438_v42, %v442_v26  ;;  %v457_v59 = vsel %vm1784_vm2, %v452_v55, %v456_v51  ;;  %v471_v61 = vsel %vm1784_vm2, %v466_v57, %v470_v54  ;;  %v1405_v3 = vld [vmem:[%s1759_s14 + $0x14] sm:$0x1]  ;;  %v916_v55 = vshrl.u32 %v1412_v47, 16 }
  0x2e   : > { %1610 = vmatpush3.bf16.msra.mxu1 %v1661_v62  ;;  %1587 = vmatprep.subr.bf16.mxu0 %v1662_v2  ;;  %v1356_v52 = vcombine.low %v429_v46, %v443_v49  ;;  %v1402_v62 = vld [vmem:[%s1759_s14 + $0x8] sm:$0xf]  ;;  %v1357_v1 = vcombine.low %v457_v59, %v471_v61  ;;  %v869_v10 = vshll.u32 %v1405_v3, 16  ;;  %v1411_v46 = vld [vmem:[%s1759_s14 + $0x2c] sm:$0x1]  ;;  %v894_v49 = vor.u32 %v893_v39, %v890_v38 }
  0x2f   : > { %1611 = vmatprep.subr.bf16.mxu1 %v1663_v4  ;;  %1557 = vmatprep.mubr.bf16.mxu0 %v1670_v7  ;;  %v1675_v7 = vld [vmem:[%s1937_s1 + $0xc8] sm:$0xff]   ;;  %v911_v54 = vshll.u32 %v1411_v46, 16 }
  0x30   : > { %1581 = vmatprep.mubr.bf16.mxu1 %v1356_v52  ;;  %v871_v17 = vrot.slane %v869_v10, 5  ;;  %v895_v57 = vrot.slane %v894_v49, 4  ;;  %v1417_v10 = vld [vmem:[%s1759_s14 + $0x44] sm:$0x1] }
  0x31   : > { %1588 = vmatpush3.bf16.msra.mxu0 %v1662_v2  ;;  %v1674_v2 = vld [vmem:[%s1937_s1 + $0x88] sm:$0xff]  }
  0x32   : > { %1612 = vmatpush3.bf16.msra.mxu1 %v1663_v4  ;;  %1589 = vmatprep.subr.bf16.mxu0 %v1664_v5  ;;  %v846_v4 = vshrl.u32 %v1402_v62, 16  ;;  %v872_v42 = vsel %vm1784_vm2, %v867_v32, %v871_v17 }
  0x33   : > { %1613 = vmatprep.subr.bf16.mxu1 %v1665_v6 }
  0x34   : > { %1558 = vmatmul.mubr.bf16.gmra.mxu0 %v1671_v22  ;;  %v848_v11 = vrot.slane %v846_v4, 4  ;;  %v1677_v22 = vld [vmem:[%s1937_s1 + $0xc0] sm:$0xff]  }
  0x35   : > { %1590 = vmatpush3.bf16.msra.mxu0 %v1664_v5  ;;  %v849_v5 = vshll.u32 %v1402_v62, 16  ;;  %1601 = vmatprep.mubr.bf16.mxu0 %v1678_v60  ;;  %v925_v60 = vshll.u32 %v1413_v50, 16  ;;  %v913_v62 = vrot.slane %v911_v54, 5 }
  0x36   : > { %1614 = vmatpush3.bf16.msra.mxu1 %v1665_v6  ;;  %1591 = vmatprep.subr.bf16.mxu0 %v1666_v14  ;;  %v855_v6 = vshll.u32 %v1403_v63, 16  ;;  %v918_v63 = vrot.slane %v916_v55, 4 }
  0x37   : > { %1615 = vmatprep.subr.bf16.mxu1 %v1667_v19  ;;  %1582 = vmatmul.mubr.bf16.gmra.mxu1 %v1357_v1  ;;  %v851_v12 = vrot.slane %v849_v5, 5  ;;  %v1414_v1 = vld [vmem:[%s1759_s14 + $0x38] sm:$0xf]  ;;  %v927_v4 = vrot.slane %v925_v60, 5  ;;  %v1415_v5 = vld [vmem:[%s1759_s14 + $0x3c] sm:$0x1] }
  0x39   : > { %1592 = vmatpush3.bf16.msra.mxu0 %v1666_v14  ;;  %v857_v14 = vrot.slane %v855_v6, 5  ;;  %v852_v18 = vor.u32 %v851_v12, %v848_v11  ;;  %v1416_v6 = vld [vmem:[%s1759_s14 + $0x40] sm:$0xf]  ;;  %v933_v11 = vshll.u32 %v1414_v1, 16  ;;  %v939_v12 = vshll.u32 %v1415_v5, 16 }
  0x3a   : > { %1616 = vmatpush3.bf16.msra.mxu1 %v1667_v19  ;;  %1593 = vmatprep.subr.bf16.mxu0 %v1668_v41  ;;  %v1406_v19 = vld [vmem:[%s1759_s14 + $0x18] sm:$0xf]  ;;  %v944_v15 = vshrl.u32 %v1416_v6, 16  ;;  %v947_v16 = vshll.u32 %v1416_v6, 16 }
  0x3b   : > { %1617 = vmatprep.subr.bf16.mxu1 %v1669_v45  ;;  %v874_v25 = vshrl.u32 %v1406_v19, 16  ;;  %v877_v26 = vshll.u32 %v1406_v19, 16  ;;  %v853_v28 = vrot.slane %v852_v18, 4  ;;  %v935_v18 = vrot.slane %v933_v11, 5 }
  0x3c   : > { %v953_v19 = vshll.u32 %v1417_v10, 16  ;;  %v949_v23 = vrot.slane %v947_v16, 5 }
  0x3d   : > { %1594 = vmatpush3.bf16.msra.mxu0 %v1668_v41  ;;  %v876_v33 = vrot.slane %v874_v25, 4  ;;  %v879_v34 = vrot.slane %v877_v26, 5  ;;  %v858_v36 = vsel %vm1784_vm2, %v853_v28, %v857_v14  ;;  %v899_v41 = vrot.slane %v897_v31, 5 }
  0x3e   : > { %1618 = vmatpush3.bf16.msra.mxu1 %v1669_v45  ;;  %1595 = vmatprep.subr.bf16.mxu0 %v1672_v56  ;;  %v1410_v45 = vld [vmem:[%s1759_s14 + $0x28] sm:$0xf]  ;;  %v1434_v48 = vcombine.low %v858_v36, %v872_v42  ;;  %v941_v26 = vrot.slane %v939_v12, 5  ;;  %v955_v29 = vrot.slane %v953_v19, 5 }
  0x3f   : > { %1619 = vmatprep.subr.bf16.mxu1 %v1673_v58  ;;  %v880_v43 = vor.u32 %v879_v34, %v876_v33  ;;  %v902_v51 = vshrl.u32 %v1410_v45, 16  ;;  %v905_v52 = vshll.u32 %v1410_v45, 16 }
  0x40   : > { %1625 = vmatprep.mubr.bf16.mxu1 %v1434_v48 }
  0x41   : > { %1596 = vmatpush3.bf16.msra.mxu0 %v1672_v56  ;;  %v881_v53 = vrot.slane %v880_v43, 4  ;;  %v919_v56 = vshll.u32 %v1412_v47, 16  ;;  %v907_v59 = vrot.slane %v905_v52, 5 }
  0x42   : > { %1620 = vmatpush3.bf16.msra.mxu1 %v1673_v58  ;;  %1597 = vmatprep.subr.bf16.mxu0 %v1674_v2  ;;  %v904_v58 = vrot.slane %v902_v51, 4 }
  0x43   : > { %1621 = vmatprep.subr.bf16.mxu1 %v1675_v7  ;;  %v886_v61 = vsel %vm1784_vm2, %v881_v53, %v885_v35  ;;  %v921_v0 = vrot.slane %v919_v56, 5 }
  0x44   : > { %v908_v3 = vor.u32 %v907_v59, %v904_v58 }
  0x45   : > { %1598 = vmatpush3.bf16.msra.mxu0 %v1674_v2  ;;  %v900_v2 = vsel %vm1784_vm2, %v895_v57, %v899_v41  ;;  %v922_v9 = vor.u32 %v921_v0, %v918_v63 }
  0x46   : > { %1622 = vmatpush3.bf16.msra.mxu1 %v1675_v7  ;;  %1599 = vmatprep.subr.bf16.mxu0 %v1676_v13  ;;  %v930_v7 = vshrl.u32 %v1414_v1, 16  ;;  %v1435_v8 = vcombine.low %v886_v61, %v900_v2 }
  0x47   : > { %1623 = vmatprep.subr.bf16.mxu1 %v1677_v22  ;;  %v923_v17 = vrot.slane %v922_v9, 4 }
  0x48   : > { %v932_v14 = vrot.slane %v930_v7, 4 }
  0x49   : > { %1600 = vmatpush3.bf16.msra.mxu0 %v1676_v13  ;;  %v909_v13 = vrot.slane %v908_v3, 4  ;;  %v928_v24 = vsel %vm1784_vm2, %v923_v17, %v927_v4  ;;  %v1446_v4 = vld [vmem:[%s1938_s2] ss:$0 sm:$0xff] }
  0x4a   : > { %1624 = vmatpush3.bf16.msra.mxu1 %v1677_v22  ;;  %v946_v22 = vrot.slane %v944_v15, 4  ;;  %v936_v25 = vor.u32 %v935_v18, %v932_v14 }
  0x4b   : > { %v914_v20 = vsel %vm1784_vm2, %v909_v13, %v913_v62 }
  0x4c   : > { %1602 = vmatmul.mubr.bf16.vlgmr.msra.gmra.mxu0 %v1679_v37  ;;  %v1436_v27 = vcombine.low %v914_v20, %v928_v24  ;;  %v950_v28 = vor.u32 %v949_v23, %v946_v22  ;;  %v937_v30 = vrot.slane %v936_v25, 4 }
  0x4d   : > { %1605 = vmatprep.mubr.bf16.mxu0 %v1680_v44  ;;  %1626 = vmatmul.mubr.bf16.vlgmr.msra.gmra.mxu1 %v1435_v8 }
  0x4e   : > { %1629 = vmatprep.mubr.bf16.mxu1 %v1436_v27  ;;  %v951_v31 = vrot.slane %v950_v28, 4  ;;  %v942_v32 = vsel %vm1784_vm2, %v937_v30, %v941_v26 }
  0x50   : > { %v956_v33 = vsel %vm1784_vm2, %v951_v31, %v955_v29 }
  0x51   : > { %v1437_v34 = vcombine.low %v942_v32, %v956_v33 }
  0x54   : > { %1606 = vmatmul.mubr.bf16.gmra.mxu0 %v1681_v21 }
  0x55   : > { %1630 = vmatmul.mubr.bf16.gmra.mxu1 %v1437_v34 }
  0xec   : > { %v1555_v35 = vpop.f32.mrf.mxu0 }
  0xed   : > { %v1579_v36 = vpop.f32.mrf.mxu1 }
  0xee   : > { %v302_v37 = vpop.f32.mrf.mxu0  ;;  %v628_v40 = vadd.f32 %v1579_v36, %v1555_v35 }
  0xef   : > { %v587_v38 = vpop.f32.mrf.mxu1 }
  0xf0   : > { %v1556_v39 = vpop.f32.mrf.mxu0  ;;  %v626_v52 = vadd.f32 %v587_v38, %v302_v37 }
  0xf1   : > { %v1580_v41 = vpop.f32.mrf.mxu1 }
  0xf2   : > { %v305_v42 = vpop.f32.mrf.mxu0  ;;  %v629_v55 = vadd.f32 %v1580_v41, %v1556_v39 }
  0xf3   : > { %v590_v44 = vpop.f32.mrf.mxu1 }
  0xf4   : > { %v1559_v43 = vpop.f32.mrf.mxu0  ;;  %v627_v60 = vadd.f32 %v590_v44, %v305_v42 }
  0xf6   : > { %v318_v46 = vpop.f32.mrf.mxu0 }
  0xf7   : > { %v1583_v45 = vpop.f32.mrf.mxu1 }
  0xf8   : > { %v1560_v48 = vpop.f32.mrf.mxu0  ;;  %v632_v13 = vadd.f32 %v1583_v45, %v1559_v43 }
  0xf9   : > { %v603_v47 = vpop.f32.mrf.mxu1 }
  0xfa   : > { %v321_v50 = vpop.f32.mrf.mxu0  ;;  %v630_v8 = vadd.f32 %v603_v47, %v318_v46 }
  0xfb   : > { %v1584_v49 = vpop.f32.mrf.mxu1 }
  0xfc   : > { %v633_v17 = vadd.f32 %v1584_v49, %v1560_v48 }
  0xfd   : > { %v606_v53 = vpop.f32.mrf.mxu1 }
  0xfe   : > { %v631_v18 = vadd.f32 %v606_v53, %v321_v50 }
 0x10c   : > { %v1603_v51 = vpop.f32.mrf.mxu0 }
 0x10d   : > { %v815_v56 = vadd.f32 %v1603_v51, %v628_v40  ;;  %v1627_v57 = vpop.f32.mrf.mxu1 }
 0x10e   : > { %v774_v54 = vpop.f32.mrf.mxu0 }
 0x10f   : > { %v813_v58 = vadd.f32 %v774_v54, %v626_v52  ;;  %v1072_v61 = vpop.f32.mrf.mxu1  ;;  %v1113_v1 = vadd.f32 %v1627_v57, %v815_v56 }
 0x110   : > { %v1604_v59 = vpop.f32.mrf.mxu0 }
 0x111   : > { %v816_v62 = vadd.f32 %v1604_v59, %v629_v55  ;;  %v1111_v63 = vadd.f32 %v1072_v61, %v813_v58  ;;  %v1628_v2 = vpop.f32.mrf.mxu1  ;;  %v1907_v12 = vadd.f32 %v1446_v4, %v1113_v1 }
 0x112   : > { %v777_v0 = vpop.f32.mrf.mxu0 }
 0x113   : > { %v814_v3 = vadd.f32 %v777_v0, %v627_v60  ;;  %v1114_v6 = vadd.f32 %v1628_v2, %v816_v62  ;;  %v1075_v7 = vpop.f32.mrf.mxu1  ;;  %v1905_v9 = vadd.f32 %v1446_v4, %v1111_v63  ;;  %v1165_v26 = vmul.f32 %v1907_v12, %v1907_v12 }
 0x114   : > { %v1607_v5 = vpop.f32.mrf.mxu0 }
 0x115   : > { %v1112_v10 = vadd.f32 %v1075_v7, %v814_v3  ;;  %v1911_v19 = vadd.f32 %v1446_v4, %v1114_v6  ;;  %v1631_v20 = vpop.f32.mrf.mxu1  ;;  %v1163_v21 = vmul.f32 %v1905_v9, %v1905_v9  ;;  %v819_v24 = vadd.f32 %v1607_v5, %v632_v13 }
 0x116   : > { %v790_v11 = vpop.f32.mrf.mxu0 }
 0x117   : > { %v1909_v14 = vadd.f32 %v1446_v4, %v1112_v10  ;;  %v817_v15 = vadd.f32 %v790_v11, %v630_v8  ;;  %v1088_v27 = vpop.f32.mrf.mxu1  ;;  %v1166_v33 = vmul.f32 %v1911_v19, %v1911_v19  ;;  %v1117_v36 = vadd.f32 %v1631_v20, %v819_v24 }
 0x118   : > { %v1608_v16 = vpop.f32.mrf.mxu0 }
 0x119   : > { %v1150_v22 = vadd.f32 %v1909_v14, %v1905_v9  ;;  %v1164_v23 = vmul.f32 %v1909_v14, %v1909_v14  ;;  %v820_v28 = vadd.f32 %v1608_v16, %v633_v17  ;;  %v1115_v31 = vadd.f32 %v1088_v27, %v817_v15  ;;  %v1632_v34 = vpop.f32.mrf.mxu1 }
 0x11a   : > { %v793_v25 = vpop.f32.mrf.mxu0  ;;  %v1148_v46 = vadd.f32 %v1446_v4, %v1117_v36 }
 0x11b   : > { %v1151_v29 = vadd.f32 %v1150_v22, %v1907_v12  ;;  %v1171_v30 = vadd.f32 %v1164_v23, %v1163_v21  ;;  %v818_v32 = vadd.f32 %v793_v25, %v631_v18  ;;  %v1146_v37 = vadd.f32 %v1446_v4, %v1115_v31  ;;  %v1091_v41 = vpop.f32.mrf.mxu1 }
 0x11c   : > { %v1118_v39 = vadd.f32 %v1632_v34, %v820_v28  ;;  %v1169_v40 = vmul.f32 %v1148_v46, %v1148_v46 }
 0x11d   : > { %v1172_v35 = vadd.f32 %v1171_v30, %v1165_v26  ;;  %v1152_v38 = vadd.f32 %v1151_v29, %v1911_v19  ;;  %v1167_v43 = vmul.f32 %v1146_v37, %v1146_v37  ;;  %v1116_v45 = vadd.f32 %v1091_v41, %v818_v32 }
 0x11e   : > { %v1149_v49 = vadd.f32 %v1446_v4, %v1118_v39 }
 0x11f   : > { %v1153_v42 = vadd.f32 %v1152_v38, %v1146_v37  ;;  %v1173_v44 = vadd.f32 %v1172_v35, %v1166_v33  ;;  %v1147_v48 = vadd.f32 %v1446_v4, %v1116_v45 }
 0x120   : > { %v1170_v54 = vmul.f32 %v1149_v49, %v1149_v49 }
 0x121   : > { %v1174_v47 = vadd.f32 %v1173_v44, %v1167_v43  ;;  %v1154_v50 = vadd.f32 %v1153_v42, %v1147_v48  ;;  %v1168_v51 = vmul.f32 %v1147_v48, %v1147_v48 }
 0x123   : > { %v1155_v52 = vadd.f32 %v1154_v50, %v1148_v46  ;;  %v1175_v53 = vadd.f32 %v1174_v47, %v1168_v51 }
 0x125   : > { %v1156_v55 = vadd.f32 %v1155_v52, %v1149_v49  ;;  %v1176_v56 = vadd.f32 %v1175_v53, %v1169_v40 }
 0x127   : > { %v1157_v57 = vrot.slane %v1156_v55, 4  ;;  %v1177_v58 = vadd.f32 %v1176_v56, %v1170_v54 }
 0x129   : > { %v1158_v59 = vadd.f32 %v1157_v57, %v1156_v55  ;;  %v1178_v60 = vrot.slane %v1177_v58, 4 }
 0x12b   : > { %v1159_v61 = vrot.slane %v1158_v59, 2  ;;  %v1179_v62 = vadd.f32 %v1178_v60, %v1177_v58 }
 0x12d   : > { %v1160_v63 = vadd.f32 %v1159_v61, %v1158_v59  ;;  %v1180_v0 = vrot.slane %v1179_v62, 2 }
 0x12f   : > { %v1161_v1 = vrot.slane %v1160_v63, 1  ;;  %v1181_v2 = vadd.f32 %v1180_v0, %v1179_v62 }
 0x131   : > { %v1162_v3 = vadd.f32 %v1161_v1, %v1160_v63  ;;  %v1182_v4 = vrot.slane %v1181_v2, 1 }
 0x133   : > { %v1183_v5 = vadd.f32 %v1182_v4, %v1181_v2  ;;  %v1184_v6 = vmul.f32 0.015625, %v1162_v3 }
 0x135   : > { %v1185_v7 = vmul.f32 0.015625, %v1183_v5  ;;  %v1186_v8 = vmul.f32 %v1184_v6, %v1184_v6  ;;  %v1189_v15 = vsub.f32 %v1905_v9, %v1184_v6  ;;  %v1190_v16 = vsub.f32 %v1909_v14, %v1184_v6 }
 0x136   : > { %v1191_v17 = vsub.f32 %v1907_v12, %v1184_v6  ;;  %v1192_v18 = vsub.f32 %v1911_v19, %v1184_v6  ;;  %v1193_v21 = vsub.f32 %v1146_v37, %v1184_v6  ;;  %v1194_v22 = vsub.f32 %v1147_v48, %v1184_v6 }
 0x137   : > { %v1187_v10 = vsub.f32 %v1185_v7, %v1186_v8  ;;  %v1195_v23 = vsub.f32 %v1148_v46, %v1184_v6  ;;  %v1196_v24 = vsub.f32 %v1149_v49, %v1184_v6 }
 0x139   : > { %v1188_v11 = vmax.f32 %v1187_v10, 0.0 }
 0x13b   : > { %v1197_v13 = vadd.f32 1e-05, %v1188_v11 }
 0x13d   : > { %1682 = vrsqrt.f32 %v1197_v13 }
 0x14a   : > { %v1683_v20 = vpop.eup %1682 }
 0x14b   : > { %v1199_v25 = vmul.f32 %v1683_v20, %v1189_v15  ;;  %v1200_v26 = vmul.f32 %v1683_v20, %v1190_v16  ;;  %v1201_v27 = vmul.f32 %v1683_v20, %v1191_v17  ;;  %v1202_v28 = vmul.f32 %v1683_v20, %v1192_v18 }
 0x14c   : > { %v1203_v29 = vmul.f32 %v1683_v20, %v1193_v21  ;;  %v1204_v30 = vmul.f32 %v1683_v20, %v1194_v22  ;;  %v1205_v31 = vmul.f32 %v1683_v20, %v1195_v23  ;;  %v1206_v9 = vmul.f32 %v1683_v20, %v1196_v24 }
 0x14d   : > { %v1207_v32 = vmul.f32 0.2, %v1199_v25  ;;  %v1208_v14 = vmul.f32 0.2, %v1200_v26  ;;  %v1209_v33 = vmul.f32 0.2, %v1201_v27 }
 0x14e   : > { %v1210_v12 = vmul.f32 0.2, %v1202_v28  ;;  %v1211_v34 = vmul.f32 0.2, %v1203_v29  ;;  %v1212_v19 = vmul.f32 0.2, %v1204_v30 }
 0x14f   : > { %v1213_v35 = vmul.f32 0.2, %v1205_v31  ;;  %v1214_v36 = vmul.f32 0.2, %v1206_v9  ;;  %v1215_v37 = vmax.f32 %v1199_v25, %v1207_v32  ;;  %v1216_v38 = vmax.f32 %v1200_v26, %v1208_v14 }
 0x150   : > { %v1217_v39 = vmax.f32 %v1201_v27, %v1209_v33  ;;  %v1218_v41 = vmax.f32 %v1202_v28, %v1210_v12  ;;  %v1219_v42 = vmax.f32 %v1203_v29, %v1211_v34  ;;  %v1220_v43 = vmax.f32 %v1204_v30, %v1212_v19 }
 0x151   : > { %v1221_v44 = vmax.f32 %v1205_v31, %v1213_v35  ;;  %v1222_v45 = vmax.f32 %v1206_v9, %v1214_v36  ;;  %v1469_v46 = vpack.c.bf16 %v1216_v38, %v1215_v37 }
 0x152   : > { %v1474_v47 = vpack.c.bf16 %v1218_v41, %v1217_v39  ;;  %v1479_v48 = vpack.c.bf16 %v1220_v43, %v1219_v42 }
 0x153   : > { %1470 = vst [vmem:[%s170_s10] sm:$0xff] %v1469_v46   ;;  %v1484_v49 = vpack.c.bf16 %v1222_v45, %v1221_v44 }
 0x154   : > { %1486 = vst [vmem:[%s170_s10 + $0x8] sm:$0xff] %v1474_v47   ;;  %1487 = vst [vmem:[%s170_s10 + $0x10] sm:$0xff] %v1479_v48  }
 0x155   : > { %1488 = vst [vmem:[%s170_s10 + $0x18] sm:$0xff] %v1484_v49  }
 0x156 PF: > { %s13_s12 = sadd.s32 1, %s1690_s12  }
 0x157   : > { %p10_p4 = scmp.ge.s32.totalorder %s13_s12, 4  }
 0x159   :  { %12 = sbr.rel (!%p10_p4) target bundleno = 1 (0x1), region = 66 }

// kernel: down_conv_forward.3
= control target key start
LH: loop header
LB: loop body
LE: loop exit
PB: predicated region body
PF: predicated region fallthrough
CT: control target
= control target key end

     0   :  { %s3362_s12 = smov 0   ;;  %s3868_s0 = inlined_call_operand.vmem [shape: bf16[2,10,10,128], index: 0, kind: input, shape index: {}]   ;;  %s3869_s1 = inlined_call_operand.vmem [shape: bf16[9,128,128], index: 1, kind: input, shape index: {}]   ;;  %s3870_s2 = inlined_call_operand.vmem [shape: f32[1,128], index: 2, kind: input, shape index: {}]   ;;  %s3871_s3 = inlined_call_operand.vmem [shape: bf16[2,64,128], index: 3, kind: output, shape index: {}]  }
   0x1 LB: > { %s2508_s13 = sadd.s32 4294967295, %s3340_s12   ;;  %p2512_p0 = scmp.ge.s32.totalorder %s3340_s12, 1  ;;  %s3340_s12 = sphi %s3362_s12, %s13_s12  }
   0x2   : > { %p137_p1 = scmp.lt.s32.totalorder %s3340_s12, 3 }
   0x4   : > { %p138_p2 = pnand %p2512_p0, %p137_p1 }
   0x6   : > { %141 = sbr.rel (%p138_p2) target bundleno = 436 (0x1b4), region = 32 }
   0xb   : > { %v3248_v0 = vld [vmem:[%s3869_s1 + $0x38] sm:$0xff]   ;;  %v3250_v2 = vld [vmem:[%s3869_s1 + $0x30] sm:$0xff]   ;;  %p161_p3 = scmp.lt.s32.totalorder %s2508_s13, 1  ;;  %v3252_v4 = vld [vmem:[%s3869_s1 + $0x28] sm:$0xff]   ;;  %vm357_vm0 = vsmask.f32 3328 }
   0xc   : > { %v3249_v1 = vld [vmem:[%s3869_s1 + $0x78] sm:$0xff]   ;;  %3007 = vmatprep.subr.bf16.mxu0 %v3248_v0  ;;  %v3251_v3 = vld [vmem:[%s3869_s1 + $0x70] sm:$0xff]   ;;  %v3253_v5 = vld [vmem:[%s3869_s1 + $0x68] sm:$0xff]   ;;  %vm358_vm1 = vsmask.f32 7440  ;;  %vm674_vm3 = vcmask 1042432  }
   0xd   : > { %3031 = vmatprep.subr.bf16.mxu1 %v3249_v1  ;;  %3008 = vmatpush3.bf16.msra.mxu0 %v3248_v0  ;;  %s3895_s13 = smov (!%p161_p3, %s2508_s13), 1  ;;  %v3254_v6 = vld [vmem:[%s3869_s1 + $0x20] sm:$0xff]   ;;  %v3256_v8 = vld [vmem:[%s3869_s1 + $0x18] sm:$0xff]   ;;  %v3258_v10 = vld [vmem:[%s3869_s1 + $0x10] sm:$0xff]   ;;  %vm675_vm4 = vcmask 1046532  }
   0xe   : > { %3032 = vmatpush3.bf16.msra.mxu1 %v3249_v1  ;;  %3009 = vmatprep.subr.bf16.mxu0 %v3250_v2  ;;  %v3255_v7 = vld [vmem:[%s3869_s1 + $0x60] sm:$0xff]   ;;  %s3239_s30 = smul.u32 80, %s3895_s13  ;;  %v3257_v9 = vld [vmem:[%s3869_s1 + $0x58] sm:$0xff]   ;;  %v3259_v11 = vld [vmem:[%s3869_s1 + $0x50] sm:$0xff]   ;;  %s2867_s18 = sshll.u32 %s3895_s13, 5 }
   0xf   : > { %3033 = vmatprep.subr.bf16.mxu1 %v3251_v3  ;;  %v3260_v16 = vld [vmem:[%s3869_s1 + $0x8] sm:$0xff]   ;;  %v3262_v39 = vld [vmem:[%s3869_s1] sm:$0xff]   ;;  %vm3434_vm2 = vmor %vm357_vm0, %vm358_vm1  ;;  %s170_s21 = scalar_lea.vmem %s3871_s3, %s2867_s18 }
  0x10   : > { %s3409_s14 = scalar_lea.vmem %s3868_s0, %s3239_s30  ;;  %v3261_v18 = vld [vmem:[%s3869_s1 + $0x48] sm:$0xff]   ;;  %v3263_v45 = vld [vmem:[%s3869_s1 + $0x40] sm:$0xff]   ;;  %v3266_v59 = vld [vmem:[%s3869_s1 + $0xb8] sm:$0xff]  }
  0x11   : > { %3010 = vmatpush3.bf16.msra.mxu0 %v3250_v2  ;;  %v3264_v12 = vld [vmem:[%s3409_s14] ss:$8 sps:$4 sm:$0xff]   ;;  %v342_v14 = vld [vmem:[%s3409_s14 + $0x4] sm:$0x1]  ;;  %v344_v17 = vld [vmem:[%s3409_s14 + $0xc] sm:$0x1] }
  0x12   : > { %3034 = vmatpush3.bf16.msra.mxu1 %v3251_v3  ;;  %3011 = vmatprep.subr.bf16.mxu0 %v3252_v4  ;;  %v341_v13 = vld [vmem:[%s3409_s14] sm:$0xf]  ;;  %v343_v15 = vld [vmem:[%s3409_s14 + $0x8] sm:$0xf]  ;;  %v370_v21 = vshll.u32 %v342_v14, 16  ;;  %v384_v24 = vshll.u32 %v344_v17, 16  ;;  %vm3496_vm5 = vmor %vm674_vm3, %vm675_vm4 }
  0x13   : > { %3035 = vmatprep.subr.bf16.mxu1 %v3253_v5  ;;  %3023 = vmatprep.mubr.bf16.mxu0 %v3264_v12  ;;  %v361_v19 = vshrl.u32 %v341_v13, 16  ;;  %v364_v20 = vshll.u32 %v341_v13, 16  ;;  %v375_v22 = vshrl.u32 %v343_v15, 16  ;;  %v378_v23 = vshll.u32 %v343_v15, 16  ;;  %v345_v29 = vld [vmem:[%s3409_s14 + $0x10] sm:$0xf] }
  0x14   : > { %v372_v27 = vrot.slane %v370_v21, 5  ;;  %v386_v31 = vrot.slane %v384_v24, 5  ;;  %v346_v32 = vld [vmem:[%s3409_s14 + $0x14] sm:$0x1]  ;;  %v347_v33 = vld [vmem:[%s3409_s14 + $0x18] sm:$0xf] }
  0x15   : > { %3012 = vmatpush3.bf16.msra.mxu0 %v3252_v4  ;;  %v363_v25 = vrot.slane %v361_v19, 4  ;;  %v366_v26 = vrot.slane %v364_v20, 5  ;;  %v377_v28 = vrot.slane %v375_v22, 4  ;;  %v380_v30 = vrot.slane %v378_v23, 5  ;;  %v348_v35 = vld [vmem:[%s3409_s14 + $0x1c] sm:$0x1] }
  0x16   : > { %3036 = vmatpush3.bf16.msra.mxu1 %v3253_v5  ;;  %3013 = vmatprep.subr.bf16.mxu0 %v3254_v6  ;;  %v389_v36 = vshrl.u32 %v345_v29, 16  ;;  %v392_v37 = vshll.u32 %v345_v29, 16  ;;  %v398_v38 = vshll.u32 %v346_v32, 16  ;;  %v403_v42 = vshrl.u32 %v347_v33, 16  ;;  %v3265_v56 = vld [vmem:[%s3409_s14 + $0x10] ss:$8 sps:$4 sm:$0xff]  }
  0x17   : > { %3037 = vmatprep.subr.bf16.mxu1 %v3255_v7  ;;  %v367_v34 = vor.u32 %v366_v26, %v363_v25  ;;  %v381_v41 = vor.u32 %v380_v30, %v377_v28  ;;  %v406_v43 = vshll.u32 %v347_v33, 16  ;;  %v412_v44 = vshll.u32 %v348_v35, 16  ;;  %v3267_v62 = vld [vmem:[%s3869_s1 + $0xf8] sm:$0xff]   ;;  %v3268_v2 = vld [vmem:[%s3869_s1 + $0xb0] sm:$0xff]   ;;  %v3270_v5 = vld [vmem:[%s3869_s1 + $0xa8] sm:$0xff]  }
  0x18   : > { %v391_v47 = vrot.slane %v389_v36, 4  ;;  %v394_v48 = vrot.slane %v392_v37, 5  ;;  %v400_v50 = vrot.slane %v398_v38, 5  ;;  %v405_v51 = vrot.slane %v403_v42, 4  ;;  %v3269_v4 = vld [vmem:[%s3869_s1 + $0xf0] sm:$0xff]   ;;  %v3272_v14 = vld [vmem:[%s3869_s1 + $0xa0] sm:$0xff]  }
  0x19   : > { %3014 = vmatpush3.bf16.msra.mxu0 %v3254_v6  ;;  %v368_v46 = vrot.slane %v367_v34, 4  ;;  %v382_v49 = vrot.slane %v381_v41, 4  ;;  %v408_v52 = vrot.slane %v406_v43, 5  ;;  %v414_v58 = vrot.slane %v412_v44, 5  ;;  %v3271_v6 = vld [vmem:[%s3869_s1 + $0xe8] sm:$0xff]   ;;  %v3273_v19 = vld [vmem:[%s3869_s1 + $0xe0] sm:$0xff]  }
  0x1a   : > { %3038 = vmatpush3.bf16.msra.mxu1 %v3255_v7  ;;  %3015 = vmatprep.subr.bf16.mxu0 %v3256_v8  ;;  %v395_v54 = vor.u32 %v394_v48, %v391_v47  ;;  %v3276_v7 = vld [vmem:[%s3409_s14 + $0x20] ss:$8 sps:$4 sm:$0xff]   ;;  %v3277_v22 = vld [vmem:[%s3409_s14 + $0x30] ss:$8 sps:$4 sm:$0xff]   ;;  %v354_v29 = vld [vmem:[%s3409_s14 + $0x34] sm:$0x1] }
  0x1b   : > { %3039 = vmatprep.subr.bf16.mxu1 %v3257_v9  ;;  %v373_v53 = vsel %vm3434_vm2, %v368_v46, %v372_v27  ;;  %v387_v55 = vsel %vm3434_vm2, %v382_v49, %v386_v31  ;;  %v409_v57 = vor.u32 %v408_v52, %v405_v51  ;;  %v353_v27 = vld [vmem:[%s3409_s14 + $0x30] sm:$0xf]  ;;  %v355_v30 = vld [vmem:[%s3409_s14 + $0x38] sm:$0xf]  ;;  %v356_v31 = vld [vmem:[%s3409_s14 + $0x3c] sm:$0x1] }
  0x1c   : > { %v2544_v60 = vcombine.low %v373_v53, %v387_v55  ;;  %v396_v61 = vrot.slane %v395_v54, 4  ;;  %v445_v33 = vshrl.u32 %v353_v27, 16  ;;  %v448_v34 = vshll.u32 %v353_v27, 16  ;;  %v3274_v41 = vld [vmem:[%s3869_s1 + $0x98] sm:$0xff]   ;;  %v650_v27 = vld [vmem:[%s3409_s14 + $0x20] sm:$0xe] }
  0x1d   : > { %3016 = vmatpush3.bf16.msra.mxu0 %v3256_v8  ;;  %v410_v63 = vrot.slane %v409_v57, 4  ;;  %v349_v8 = vld [vmem:[%s3409_s14 + $0x20] sm:$0xf]  ;;  %v454_v35 = vshll.u32 %v354_v29, 16  ;;  %v459_v37 = vshrl.u32 %v355_v30, 16  ;;  %v462_v38 = vshll.u32 %v355_v30, 16 }
  0x1e   : > { %3040 = vmatpush3.bf16.msra.mxu1 %v3257_v9  ;;  %3017 = vmatprep.subr.bf16.mxu0 %v3258_v10  ;;  %v401_v0 = vsel %vm3434_vm2, %v396_v61, %v400_v50  ;;  %v350_v9 = vld [vmem:[%s3409_s14 + $0x24] sm:$0x1]  ;;  %v417_v12 = vshrl.u32 %v349_v8, 16  ;;  %v420_v13 = vshll.u32 %v349_v8, 16  ;;  %v447_v43 = vrot.slane %v445_v33, 4  ;;  %v3278_v57 = vld [vmem:[%s3869_s1 + $0x90] sm:$0xff]  }
  0x1f   : > { %3041 = vmatprep.subr.bf16.mxu1 %v3259_v11  ;;  %3047 = vmatprep.mubr.bf16.mxu1 %v2544_v60  ;;  %v415_v1 = vsel %vm3434_vm2, %v410_v63, %v414_v58  ;;  %v426_v15 = vshll.u32 %v350_v9, 16  ;;  %v450_v44 = vrot.slane %v448_v34, 5  ;;  %v461_v47 = vrot.slane %v459_v37, 4  ;;  %v642_v61 = vld [vmem:[%s3409_s14] sm:$0xe]  ;;  %v3329_v40 = vld [vmem:[%s3869_s1 + $0x210] sm:$0xff]  }
  0x20   : > { %v2545_v3 = vcombine.low %v401_v0, %v415_v1  ;;  %v419_v20 = vrot.slane %v417_v12, 4  ;;  %v422_v21 = vrot.slane %v420_v13, 5  ;;  %v464_v48 = vrot.slane %v462_v38, 5  ;;  %v644_v63 = vld [vmem:[%s3409_s14 + $0x8] sm:$0xe] }
  0x21   : > { %3018 = vmatpush3.bf16.msra.mxu0 %v3258_v10  ;;  %v351_v10 = vld [vmem:[%s3409_s14 + $0x28] sm:$0xf]  ;;  %v428_v23 = vrot.slane %v426_v15, 5  ;;  %v451_v50 = vor.u32 %v450_v44, %v447_v43  ;;  %v456_v51 = vrot.slane %v454_v35, 5  ;;  %v646_v9 = vld [vmem:[%s3409_s14 + $0x10] sm:$0xe] }
  0x22   : > { %3042 = vmatpush3.bf16.msra.mxu1 %v3259_v11  ;;  %3019 = vmatprep.subr.bf16.mxu0 %v3260_v16  ;;  %v352_v11 = vld [vmem:[%s3409_s14 + $0x2c] sm:$0x1]  ;;  %v434_v17 = vshll.u32 %v351_v10, 16  ;;  %v423_v28 = vor.u32 %v422_v21, %v419_v20  ;;  %v465_v53 = vor.u32 %v464_v48, %v461_v47  ;;  %v648_v12 = vld [vmem:[%s3409_s14 + $0x18] sm:$0xe]  ;;  %v3289_v47 = vld [vmem:[%s3869_s1 + $0x170] sm:$0xff]  }
  0x23   : > { %3043 = vmatprep.subr.bf16.mxu1 %v3261_v18  ;;  %v3280_v1 = vld [vmem:[%s3869_s1 + $0x88] sm:$0xff]   ;;  %v649_v13 = vld [vmem:[%s3409_s14 + $0x1c] sm:$0x1]  ;;  %v655_v38 = vld [vmem:[%s3409_s14 + $0x34] sm:$0x1] }
  0x24   : > { %v436_v25 = vrot.slane %v434_v17, 5  ;;  %v424_v36 = vrot.slane %v423_v28, 4  ;;  %v466_v58 = vrot.slane %v465_v53, 4  ;;  %v3284_v21 = vld [vmem:[%s3409_s14 + $0x8] ss:$8 sps:$4 sm:$0xff]  }
  0x25   : > { %3020 = vmatpush3.bf16.msra.mxu0 %v3260_v16  ;;  %v431_v16 = vshrl.u32 %v351_v10, 16  ;;  %v647_v10 = vld [vmem:[%s3409_s14 + $0x14] sm:$0x1]  ;;  %v651_v28 = vld [vmem:[%s3409_s14 + $0x24] sm:$0x1] }
  0x26   : > { %3044 = vmatpush3.bf16.msra.mxu1 %v3261_v18  ;;  %3021 = vmatprep.subr.bf16.mxu0 %v3262_v39  ;;  %v440_v18 = vshll.u32 %v352_v11, 16  ;;  %v429_v46 = vsel %vm3434_vm2, %v424_v36, %v428_v23  ;;  %v687_v15 = vrot.slane %v647_v10, 5  ;;  %v3285_v23 = vld [vmem:[%s3869_s1 + $0x138] sm:$0xff]   ;;  %v652_v29 = vld [vmem:[%s3409_s14 + $0x28] sm:$0xe]  ;;  %v695_v33 = vrot.slane %v651_v28, 5 }
  0x27   : > { %3045 = vmatprep.subr.bf16.mxu1 %v3263_v45  ;;  %v433_v24 = vrot.slane %v431_v16, 4  ;;  %v3282_v16 = vld [vmem:[%s3869_s1 + $0x80] sm:$0xff]   ;;  %v653_v30 = vld [vmem:[%s3409_s14 + $0x2c] sm:$0x1]  ;;  %v2561_v34 = vrot.slane %v652_v29, 9 }
  0x28   : > { %v442_v26 = vrot.slane %v440_v18, 5  ;;  %v2559_v18 = vrot.slane %v648_v12, 9  ;;  %v699_v35 = vrot.slane %v653_v30, 5  ;;  %v654_v36 = vld [vmem:[%s3409_s14 + $0x30] sm:$0xe] }
  0x29   : > { %3022 = vmatpush3.bf16.msra.mxu0 %v3262_v39  ;;  %v437_v32 = vor.u32 %v436_v25, %v433_v24  ;;  %v468_v39 = vshll.u32 %v356_v31, 16  ;;  %v3287_v31 = vld [vmem:[%s3409_s14 + $0x18] ss:$8 sps:$4 sm:$0xff]   ;;  %v2562_v44 = vrot.slane %v654_v36, 9 }
  0x2a   : > { %3046 = vmatpush3.bf16.msra.mxu1 %v3263_v45  ;;  %3055 = vmatprep.subr.bf16.mxu0 %v3266_v59  ;;  %v3275_v45 = vld [vmem:[%s3869_s1 + $0xd8] sm:$0xff]   ;;  %v700_v43 = vsel %vm3496_vm5, %v2561_v34, %v699_v35 }
  0x2b   : > { %3079 = vmatprep.subr.bf16.mxu1 %v3267_v62  ;;  %v438_v42 = vrot.slane %v437_v32, 4  ;;  %v470_v54 = vrot.slane %v468_v39, 5  ;;  %v2560_v32 = vrot.slane %v650_v27, 9  ;;  %v656_v39 = vld [vmem:[%s3409_s14 + $0x38] sm:$0xe]  ;;  %v3301_v27 = vld [vmem:[%s3869_s1 + $0x148] sm:$0xff]  }
  0x2c   : > { %3024 = vmatmul.mubr.bf16.vlgmr.msra.gmra.mxu0 %v3265_v56  ;;  %v452_v56 = vrot.slane %v451_v50, 4  ;;  %v2563_v48 = vrot.slane %v656_v39, 9 }
  0x2d   : > { %3048 = vmatmul.mubr.bf16.vlgmr.msra.gmra.mxu1 %v2545_v3  ;;  %3056 = vmatpush3.bf16.msra.mxu0 %v3266_v59  ;;  %v443_v49 = vsel %vm3434_vm2, %v438_v42, %v442_v26  ;;  %v3279_v59 = vld [vmem:[%s3869_s1 + $0xd0] sm:$0xff]   ;;  %v471_v0 = vsel %vm3434_vm2, %v466_v58, %v470_v54  ;;  %v2556_v3 = vrot.slane %v642_v61, 9  ;;  %v3286_v26 = vld [vmem:[%s3869_s1 + $0x178] sm:$0xff]   ;;  %v696_v42 = vsel %vm3496_vm5, %v2560_v32, %v695_v33  ;;  %v3290_v54 = vld [vmem:[%s3869_s1 + $0x128] sm:$0xff]  }
  0x2e   : > { %3080 = vmatpush3.bf16.msra.mxu1 %v3267_v62  ;;  %3057 = vmatprep.subr.bf16.mxu0 %v3268_v2  ;;  %v2546_v52 = vcombine.low %v429_v46, %v443_v49  ;;  %v457_v60 = vsel %vm3434_vm2, %v452_v56, %v456_v51  ;;  %v643_v62 = vld [vmem:[%s3409_s14 + $0x4] sm:$0x1]  ;;  %v3288_v46 = vld [vmem:[%s3869_s1 + $0x130] sm:$0xff]   ;;  %v2582_v50 = vcombine.low %v696_v42, %v700_v43  ;;  %v3291_v56 = vld [vmem:[%s3869_s1 + $0x168] sm:$0xff]  }
  0x2f   : > { %3081 = vmatprep.subr.bf16.mxu1 %v3269_v4  ;;  %3027 = vmatprep.mubr.bf16.mxu0 %v3276_v7  ;;  %v3281_v7 = vld [vmem:[%s3869_s1 + $0xc8] sm:$0xff]   ;;  %v3293_v58 = vld [vmem:[%s3409_s14 + $0x38] ss:$8 sps:$4 sm:$0xff]   ;;  %v2675_v43 = vld [vmem:[%s3409_s14 + $0x14] sm:$0x1] }
  0x30   : > { %3051 = vmatprep.mubr.bf16.mxu1 %v2546_v52  ;;  %v3292_v51 = vld [vmem:[%s3409_s14 + $0x28] ss:$8 sps:$4 sm:$0xff]   ;;  %v3296_v61 = vld [vmem:[%s3869_s1 + $0x118] sm:$0xff]   ;;  %v2673_v32 = vld [vmem:[%s3409_s14 + $0xc] sm:$0x1] }
  0x31   : > { %3058 = vmatpush3.bf16.msra.mxu0 %v3268_v2  ;;  %v645_v2 = vld [vmem:[%s3409_s14 + $0xc] sm:$0x1] }
  0x32   : > { %3082 = vmatpush3.bf16.msra.mxu1 %v3269_v4  ;;  %3059 = vmatprep.subr.bf16.mxu0 %v3270_v5  ;;  %v679_v4 = vrot.slane %v643_v62, 5  ;;  %v683_v8 = vrot.slane %v645_v2, 5  ;;  %v3297_v62 = vld [vmem:[%s3869_s1 + $0x158] sm:$0xff]   ;;  %v2630_v2 = vld [vmem:[%s3409_s14 + $0x10] sm:$0xf] }
  0x33   : > { %3083 = vmatprep.subr.bf16.mxu1 %v3271_v6 }
  0x34   : > { %3028 = vmatmul.mubr.bf16.gmra.mxu0 %v3277_v22  ;;  %v680_v11 = vsel %vm3496_vm5, %v2556_v3, %v679_v4  ;;  %v3283_v22 = vld [vmem:[%s3869_s1 + $0xc0] sm:$0xff]   ;;  %v2631_v3 = vld [vmem:[%s3409_s14 + $0x14] sm:$0x1] }
  0x35   : > { %3060 = vmatpush3.bf16.msra.mxu0 %v3270_v5  ;;  %v2557_v5 = vrot.slane %v644_v63, 9  ;;  %v2628_v63 = vld [vmem:[%s3409_s14 + $0x8] sm:$0xf]  ;;  %v1106_v10 = vshll.u32 %v2631_v3, 16 }
  0x36   : > { %3084 = vmatpush3.bf16.msra.mxu1 %v3271_v6  ;;  %3061 = vmatprep.subr.bf16.mxu0 %v3272_v14  ;;  %v2547_v6 = vcombine.low %v457_v60, %v471_v0  ;;  %v3295_v60 = vld [vmem:[%s3869_s1 + $0x160] sm:$0xff]   ;;  %v2629_v0 = vld [vmem:[%s3409_s14 + $0xc] sm:$0x1]  ;;  %v1083_v4 = vshrl.u32 %v2628_v63, 16 }
  0x37   : > { %3085 = vmatprep.subr.bf16.mxu1 %v3273_v19  ;;  %v684_v17 = vsel %vm3496_vm5, %v2557_v5, %v683_v8  ;;  %v1086_v5 = vshll.u32 %v2628_v63, 16  ;;  %v1097_v8 = vshrl.u32 %v2630_v2, 16  ;;  %v2679_v63 = vld [vmem:[%s3409_s14 + $0x24] sm:$0x1] }
  0x38   : > { %3052 = vmatmul.mubr.bf16.gmra.mxu1 %v2547_v6  ;;  %v2580_v20 = vcombine.low %v680_v11, %v684_v17  ;;  %v3299_v6 = vld [vmem:[%s3869_s1 + $0x150] sm:$0xff]   ;;  %v2632_v11 = vld [vmem:[%s3409_s14 + $0x18] sm:$0xf]  ;;  %v1085_v12 = vrot.slane %v1083_v4, 4 }
  0x39   : > { %3062 = vmatpush3.bf16.msra.mxu0 %v3272_v14  ;;  %v2558_v14 = vrot.slane %v646_v9, 9  ;;  %3095 = vmatprep.mubr.bf16.mxu1 %v3284_v21  ;;  %v1100_v9 = vshll.u32 %v2630_v2, 16  ;;  %v1099_v17 = vrot.slane %v1097_v8, 4  ;;  %v3300_v21 = vld [vmem:[%s3869_s1 + $0x108] sm:$0xff]  }
  0x3a   : > { %3086 = vmatpush3.bf16.msra.mxu1 %v3273_v19  ;;  %3063 = vmatprep.subr.bf16.mxu0 %v3274_v41  ;;  %v691_v19 = vrot.slane %v649_v13, 5  ;;  %v1088_v13 = vrot.slane %v1086_v5, 5 }
  0x3b   : > { %3087 = vmatprep.subr.bf16.mxu1 %v3275_v45  ;;  %3071 = vmatprep.mubr.bf16.mxu0 %v2580_v20  ;;  %v688_v24 = vsel %vm3496_vm5, %v2558_v14, %v687_v15  ;;  %v2633_v14 = vld [vmem:[%s3409_s14 + $0x1c] sm:$0x1]  ;;  %v2634_v15 = vld [vmem:[%s3409_s14 + $0x20] sm:$0xf]  ;;  %v2635_v20 = vld [vmem:[%s3409_s14 + $0x24] sm:$0x1] }
  0x3c   : > { %v692_v25 = vsel %vm3496_vm5, %v2559_v18, %v691_v19  ;;  %v1102_v18 = vrot.slane %v1100_v9, 5  ;;  %v1108_v19 = vrot.slane %v1106_v10, 5  ;;  %v1125_v29 = vshrl.u32 %v2634_v15, 16  ;;  %v2636_v10 = vld [vmem:[%s3409_s14 + $0x28] sm:$0xf] }
  0x3d   : > { %3064 = vmatpush3.bf16.msra.mxu0 %v3274_v41  ;;  %v2581_v37 = vcombine.low %v688_v24, %v692_v25  ;;  %v657_v41 = vld [vmem:[%s3409_s14 + $0x3c] sm:$0x1]  ;;  %v1114_v24 = vshll.u32 %v2632_v11, 16  ;;  %v1120_v25 = vshll.u32 %v2633_v14, 16  ;;  %v1128_v30 = vshll.u32 %v2634_v15, 16 }
  0x3e   : > { %3088 = vmatpush3.bf16.msra.mxu1 %v3275_v45  ;;  %3065 = vmatprep.subr.bf16.mxu0 %v3278_v57  ;;  %v703_v45 = vrot.slane %v655_v38, 5  ;;  %v707_v49 = vrot.slane %v657_v41, 5  ;;  %v1103_v28 = vor.u32 %v1102_v18, %v1099_v17  ;;  %v1127_v39 = vrot.slane %v1125_v29, 4  ;;  %v2639_v15 = vld [vmem:[%s3409_s14 + $0x34] sm:$0x1] }
  0x3f   : > { %3089 = vmatprep.subr.bf16.mxu1 %v3279_v59  ;;  %v1116_v35 = vrot.slane %v1114_v24, 5  ;;  %v1122_v36 = vrot.slane %v1120_v25, 5  ;;  %v1130_v41 = vrot.slane %v1128_v30, 5  ;;  %v1142_v17 = vshll.u32 %v2636_v10, 16  ;;  %v2640_v24 = vld [vmem:[%s3409_s14 + $0x38] sm:$0xf] }
  0x40   : > { %v704_v52 = vsel %vm3496_vm5, %v2562_v44, %v703_v45  ;;  %v708_v53 = vsel %vm3496_vm5, %v2563_v48, %v707_v49  ;;  %v1104_v38 = vrot.slane %v1103_v28, 4  ;;  %v3302_v44 = vld [vmem:[%s3869_s1 + $0x100] sm:$0xff]   ;;  %v1398_v48 = vrot.slane %v2673_v32, 5  ;;  %v2641_v28 = vld [vmem:[%s3409_s14 + $0x3c] sm:$0x1] }
  0x41   : > { %3066 = vmatpush3.bf16.msra.mxu0 %v3278_v57  ;;  %v2583_v57 = vcombine.low %v704_v52, %v708_v53  ;;  %v1402_v52 = vrot.slane %v2675_v43, 5  ;;  %v3303_v53 = vld [vmem:[%s3869_s1 + $0x140] sm:$0xff]   ;;  %v1167_v29 = vshrl.u32 %v2640_v24, 16 }
  0x42   : > { %3090 = vmatpush3.bf16.msra.mxu1 %v3279_v59  ;;  %3067 = vmatprep.subr.bf16.mxu0 %v3280_v1  ;;  %v3294_v59 = vld [vmem:[%s3869_s1 + $0x120] sm:$0xff]   ;;  %v1109_v49 = vsel %vm3434_vm2, %v1104_v38, %v1108_v19 }
  0x43   : > { %3091 = vmatprep.subr.bf16.mxu1 %v3281_v7  ;;  %v1169_v38 = vrot.slane %v1167_v29, 4  ;;  %v3316_v29 = vld [vmem:[%s3869_s1 + $0x188] sm:$0xff]  }
  0x45   : > { %3068 = vmatpush3.bf16.msra.mxu0 %v3280_v1  ;;  %v3298_v1 = vld [vmem:[%s3869_s1 + $0x110] sm:$0xff]  }
  0x46   : > { %3092 = vmatpush3.bf16.msra.mxu1 %v3281_v7  ;;  %3069 = vmatprep.subr.bf16.mxu0 %v3282_v16  ;;  %v1092_v7 = vshll.u32 %v2629_v0, 16 }
  0x47   : > { %3093 = vmatprep.subr.bf16.mxu1 %v3283_v22 }
  0x49   : > { %3070 = vmatpush3.bf16.msra.mxu0 %v3282_v16  ;;  %v1094_v16 = vrot.slane %v1092_v7, 5  ;;  %v1410_v7 = vrot.slane %v2679_v63, 5  ;;  %v2683_v63 = vld [vmem:[%s3409_s14 + $0x34] sm:$0x1] }
  0x4a   : > { %3094 = vmatpush3.bf16.msra.mxu1 %v3283_v22  ;;  %3103 = vmatprep.subr.bf16.mxu0 %v3285_v23  ;;  %v1089_v22 = vor.u32 %v1088_v13, %v1085_v12  ;;  %v2638_v12 = vld [vmem:[%s3409_s14 + $0x30] sm:$0xf]  ;;  %v3305_v13 = vld [vmem:[%s3869_s1 + $0x1f8] sm:$0xff]  }
  0x4b   : > { %3127 = vmatprep.subr.bf16.mxu1 %v3286_v26 }
  0x4c   : > { %3072 = vmatmul.mubr.bf16.vlgmr.msra.gmra.mxu0 %v2581_v37  ;;  %v1090_v33 = vrot.slane %v1089_v22, 4  ;;  %v2674_v37 = vld [vmem:[%s3409_s14 + $0x10] sm:$0xe]  ;;  %v1156_v22 = vshll.u32 %v2638_v12, 16 }
  0x4d   : > { %3096 = vmatmul.mubr.bf16.vlgmr.msra.gmra.mxu1 %v3287_v31  ;;  %3104 = vmatpush3.bf16.msra.mxu0 %v3285_v23  ;;  %v1111_v23 = vshrl.u32 %v2632_v11, 16  ;;  %v1134_v31 = vshll.u32 %v2635_v20, 16  ;;  %v2637_v11 = vld [vmem:[%s3409_s14 + $0x2c] sm:$0x1]  ;;  %v3306_v20 = vld [vmem:[%s3869_s1 + $0x1b0] sm:$0xff]  }
  0x4e   : > { %3128 = vmatpush3.bf16.msra.mxu1 %v3286_v26  ;;  %3105 = vmatprep.subr.bf16.mxu0 %v3288_v46  ;;  %v2672_v26 = vld [vmem:[%s3409_s14 + $0x8] sm:$0xe]  ;;  %v1095_v45 = vsel %vm3434_vm2, %v1090_v33, %v1094_v16  ;;  %v1139_v16 = vshrl.u32 %v2636_v10, 16  ;;  %v1148_v18 = vshll.u32 %v2637_v11, 16  ;;  %v2642_v33 = vld [vmem:[%s3409_s14 + $0x40] sm:$0xf] }
  0x4f   : > { %3129 = vmatprep.subr.bf16.mxu1 %v3289_v47  ;;  %3075 = vmatprep.mubr.bf16.mxu0 %v2582_v50  ;;  %v1113_v34 = vrot.slane %v1111_v23, 4  ;;  %v1136_v42 = vrot.slane %v1134_v31, 5  ;;  %v1131_v50 = vor.u32 %v1130_v41, %v1127_v39  ;;  %v1162_v23 = vshll.u32 %v2639_v15, 16  ;;  %v2686_v10 = vld [vmem:[%s3409_s14 + $0x40] sm:$0xe] }
  0x50   : > { %3099 = vmatprep.mubr.bf16.mxu1 %v3292_v51  ;;  %v2689_v51 = vrot.slane %v2674_v37, 9  ;;  %v1141_v25 = vrot.slane %v1139_v16, 4  ;;  %v1158_v31 = vrot.slane %v1156_v22, 5  ;;  %v2643_v37 = vld [vmem:[%s3409_s14 + $0x44] sm:$0x1]  ;;  %v1176_v39 = vshll.u32 %v2641_v28, 16 }
  0x51   : > { %3106 = vmatpush3.bf16.msra.mxu0 %v3288_v46  ;;  %v1117_v46 = vor.u32 %v1116_v35, %v1113_v34  ;;  %v1164_v32 = vrot.slane %v1162_v23, 5  ;;  %v1170_v34 = vshll.u32 %v2640_v24, 16  ;;  %v3307_v35 = vld [vmem:[%s3869_s1 + $0x1f0] sm:$0xff]   ;;  %v1181_v41 = vshrl.u32 %v2642_v33, 16  ;;  %v2687_v15 = vld [vmem:[%s3409_s14 + $0x44] sm:$0x1] }
  0x52   : > { %3130 = vmatpush3.bf16.msra.mxu1 %v3289_v47  ;;  %3107 = vmatprep.subr.bf16.mxu0 %v3290_v54  ;;  %v2688_v47 = vrot.slane %v2672_v26, 9  ;;  %v1144_v26 = vrot.slane %v1142_v17, 5  ;;  %v2695_v17 = vrot.slane %v2686_v10, 9  ;;  %v3313_v24 = vld [vmem:[%s3869_s1 + $0x1d8] sm:$0xff]   ;;  %v3315_v28 = vld [vmem:[%s3869_s1 + $0x1d0] sm:$0xff]  }
  0x53   : > { %3131 = vmatprep.subr.bf16.mxu1 %v3291_v56  ;;  %v1172_v43 = vrot.slane %v1170_v34, 5  ;;  %v2762_v34 = vld [vmem:[%s3409_s14 + $0x18] sm:$0xf] }
  0x54   : > { %3076 = vmatmul.mubr.bf16.gmra.mxu0 %v2583_v57  ;;  %v1399_v57 = vsel %vm3496_vm5, %v2688_v47, %v1398_v48  ;;  %v1178_v47 = vrot.slane %v1176_v39, 5  ;;  %v1183_v48 = vrot.slane %v1181_v41, 4  ;;  %v1816_v39 = vshrl.u32 %v2762_v34, 16 }
  0x55   : > { %3108 = vmatpush3.bf16.msra.mxu0 %v3290_v54  ;;  %3100 = vmatmul.mubr.bf16.gmra.mxu1 %v3293_v58  ;;  %v2660_v54 = vcombine.low %v1095_v45, %v1109_v49  ;;  %v2676_v58 = vld [vmem:[%s3409_s14 + $0x18] sm:$0xe]  ;;  %v1190_v45 = vshll.u32 %v2643_v37, 16  ;;  %v3308_v49 = vld [vmem:[%s3869_s1 + $0x1a8] sm:$0xff]   ;;  %v1819_v41 = vshll.u32 %v2762_v34, 16 }
  0x56   : > { %3132 = vmatpush3.bf16.msra.mxu1 %v3291_v56  ;;  %3109 = vmatprep.subr.bf16.mxu0 %v3294_v59  ;;  %v1118_v56 = vrot.slane %v1117_v46, 4  ;;  %v2690_v0 = vrot.slane %v2676_v58, 9  ;;  %v2681_v58 = vld [vmem:[%s3409_s14 + $0x2c] sm:$0x1] }
  0x57   : > { %3133 = vmatprep.subr.bf16.mxu1 %v3295_v60  ;;  %3119 = vmatprep.mubr.bf16.mxu0 %v2660_v54  ;;  %v3309_v54 = vld [vmem:[%s3869_s1 + $0x1e8] sm:$0xff]  }
  0x59   : > { %3110 = vmatpush3.bf16.msra.mxu0 %v3294_v59  ;;  %v2677_v59 = vld [vmem:[%s3409_s14 + $0x1c] sm:$0x1] }
  0x5a   : > { %3134 = vmatpush3.bf16.msra.mxu1 %v3295_v60  ;;  %3111 = vmatprep.subr.bf16.mxu0 %v3296_v61  ;;  %v1132_v60 = vrot.slane %v1131_v50, 4  ;;  %v1406_v3 = vrot.slane %v2677_v59, 5 }
  0x5b   : > { %3135 = vmatprep.subr.bf16.mxu1 %v3297_v62 }
  0x5c   : > { %v1137_v5 = vsel %vm3434_vm2, %v1132_v60, %v1136_v42  ;;  %v1407_v9 = vsel %vm3496_vm5, %v2690_v0, %v1406_v3 }
  0x5d   : > { %3112 = vmatpush3.bf16.msra.mxu0 %v3296_v61  ;;  %v1403_v61 = vsel %vm3496_vm5, %v2689_v51, %v1402_v52  ;;  %v1173_v51 = vor.u32 %v1172_v43, %v1169_v38  ;;  %v3318_v43 = vld [vmem:[%s3869_s1 + $0x180] sm:$0xff]  }
  0x5e   : > { %3136 = vmatpush3.bf16.msra.mxu1 %v3297_v62  ;;  %3113 = vmatprep.subr.bf16.mxu0 %v3298_v1  ;;  %v2678_v62 = vld [vmem:[%s3409_s14 + $0x20] sm:$0xe]  ;;  %v2712_v2 = vcombine.low %v1399_v57, %v1403_v61  ;;  %v2680_v57 = vld [vmem:[%s3409_s14 + $0x28] sm:$0xe] }
  0x5f   : > { %3137 = vmatprep.subr.bf16.mxu1 %v3299_v6  ;;  %v2691_v4 = vrot.slane %v2678_v62, 9  ;;  %v1174_v60 = vrot.slane %v1173_v51, 4  ;;  %v2682_v62 = vld [vmem:[%s3409_s14 + $0x30] sm:$0xe]  ;;  %v2692_v0 = vrot.slane %v2680_v57, 9 }
  0x60   : > { %3143 = vmatprep.mubr.bf16.mxu1 %v2712_v2  ;;  %v1414_v2 = vrot.slane %v2681_v58, 5  ;;  %v2693_v3 = vrot.slane %v2682_v62, 9  ;;  %v2764_v51 = vld [vmem:[%s3409_s14 + $0x20] sm:$0xf] }
  0x61   : > { %3114 = vmatpush3.bf16.msra.mxu0 %v3298_v1  ;;  %v1123_v1 = vsel %vm3434_vm2, %v1118_v56, %v1122_v36  ;;  %v1411_v14 = vsel %vm3496_vm5, %v2691_v4, %v1410_v7  ;;  %v1145_v36 = vor.u32 %v1144_v26, %v1141_v25  ;;  %v1418_v4 = vrot.slane %v2683_v63, 5 }
  0x62   : > { %3138 = vmatpush3.bf16.msra.mxu1 %v3299_v6  ;;  %3115 = vmatprep.subr.bf16.mxu0 %v3300_v21  ;;  %v3304_v6 = vld [vmem:[%s3869_s1 + $0x1b8] sm:$0xff]   ;;  %v2661_v8 = vcombine.low %v1123_v1, %v1137_v5  ;;  %v2713_v19 = vcombine.low %v1407_v9, %v1411_v14  ;;  %v1179_v7 = vsel %vm3434_vm2, %v1174_v60, %v1178_v47  ;;  %v1830_v57 = vshrl.u32 %v2764_v51, 16 }
  0x63   : > { %3139 = vmatprep.subr.bf16.mxu1 %v3301_v27  ;;  %v1146_v46 = vrot.slane %v1145_v36, 4  ;;  %v2684_v5 = vld [vmem:[%s3409_s14 + $0x38] sm:$0xe]  ;;  %v2685_v9 = vld [vmem:[%s3409_s14 + $0x3c] sm:$0x1]  ;;  %v1419_v14 = vsel %vm3496_vm5, %v2693_v3, %v1418_v4  ;;  %v1833_v58 = vshll.u32 %v2764_v51, 16 }
  0x64   : > { %v2694_v11 = vrot.slane %v2684_v5, 9  ;;  %v1422_v16 = vrot.slane %v2685_v9, 5  ;;  %v3322_v4 = vld [vmem:[%s3869_s1 + $0x238] sm:$0xff]  }
  0x65   : > { %3116 = vmatpush3.bf16.msra.mxu0 %v3300_v21  ;;  %v1153_v21 = vshrl.u32 %v2638_v12, 16  ;;  %v3311_v12 = vld [vmem:[%s3869_s1 + $0x1e0] sm:$0xff]  }
  0x66   : > { %3140 = vmatpush3.bf16.msra.mxu1 %v3301_v27  ;;  %3117 = vmatprep.subr.bf16.mxu0 %v3302_v44  ;;  %v1150_v27 = vrot.slane %v1148_v18, 5  ;;  %v1423_v23 = vsel %vm3496_vm5, %v2694_v11, %v1422_v16 }
  0x67   : > { %3141 = vmatprep.subr.bf16.mxu1 %v3303_v53  ;;  %v1155_v30 = vrot.slane %v1153_v21, 4  ;;  %v3312_v21 = vld [vmem:[%s3869_s1 + $0x198] sm:$0xff]  }
  0x68   : > { %v1151_v56 = vsel %vm3434_vm2, %v1146_v46, %v1150_v27  ;;  %v3314_v27 = vld [vmem:[%s3869_s1 + $0x190] sm:$0xff]  }
  0x69   : > { %3118 = vmatpush3.bf16.msra.mxu0 %v3302_v44  ;;  %v1159_v42 = vor.u32 %v1158_v31, %v1155_v30  ;;  %v1184_v44 = vshll.u32 %v2642_v33, 16  ;;  %v3320_v30 = vld [vmem:[%s3409_s14 + $0x10] ss:$8 sps:$4 sm:$0xff]   ;;  %v3317_v31 = vld [vmem:[%s3869_s1 + $0x1c8] sm:$0xff]   ;;  %v2761_v33 = vld [vmem:[%s3409_s14 + $0x14] sm:$0x1] }
  0x6a   : > { %3142 = vmatpush3.bf16.msra.mxu1 %v3303_v53  ;;  %3151 = vmatprep.subr.bf16.mxu0 %v3304_v6  ;;  %v1192_v53 = vrot.slane %v1190_v45, 5  ;;  %v1811_v38 = vshll.u32 %v2761_v33, 16 }
  0x6b   : > { %3175 = vmatprep.subr.bf16.mxu1 %v3305_v13  ;;  %v1160_v50 = vrot.slane %v1159_v42, 4  ;;  %v1186_v52 = vrot.slane %v1184_v44, 5  ;;  %v3319_v44 = vld [vmem:[%s3869_s1 + $0x1c0] sm:$0xff]  }
  0x6c   : > { %3120 = vmatmul.mubr.bf16.vlgmr.msra.gmra.mxu0 %v2661_v8  ;;  %v1813_v47 = vrot.slane %v1811_v38, 5 }
  0x6d   : > { %3144 = vmatmul.mubr.bf16.vlgmr.msra.gmra.mxu1 %v2713_v19  ;;  %3152 = vmatpush3.bf16.msra.mxu0 %v3304_v6  ;;  %v1165_v59 = vsel %vm3434_vm2, %v1160_v50, %v1164_v32  ;;  %v1187_v61 = vor.u32 %v1186_v52, %v1183_v48  ;;  %v3310_v6 = vld [vmem:[%s3869_s1 + $0x1a0] sm:$0xff]   ;;  %v2760_v32 = vld [vmem:[%s3409_s14 + $0x10] sm:$0xf]  ;;  %v1818_v48 = vrot.slane %v1816_v39, 4 }
  0x6e   : > { %3176 = vmatpush3.bf16.msra.mxu1 %v3305_v13  ;;  %3153 = vmatprep.subr.bf16.mxu0 %v3306_v20  ;;  %v2662_v1 = vcombine.low %v1151_v56, %v1165_v59  ;;  %v1415_v13 = vsel %vm3496_vm5, %v2692_v0, %v1414_v2  ;;  %v1802_v36 = vshrl.u32 %v2760_v32, 16  ;;  %v1805_v37 = vshll.u32 %v2760_v32, 16  ;;  %v2765_v52 = vld [vmem:[%s3409_s14 + $0x24] sm:$0x1]  ;;  %v2767_v56 = vld [vmem:[%s3409_s14 + $0x2c] sm:$0x1] }
  0x6f   : > { %3177 = vmatprep.subr.bf16.mxu1 %v3307_v35  ;;  %v1188_v8 = vrot.slane %v1187_v61, 4  ;;  %v2714_v19 = vcombine.low %v1415_v13, %v1419_v14  ;;  %v1839_v60 = vshll.u32 %v2765_v52, 16  ;;  %v1832_v0 = vrot.slane %v1830_v57, 4  ;;  %v3324_v14 = vld [vmem:[%s3409_s14 + $0x30] ss:$8 sps:$4 sm:$0xff]   ;;  %v3326_v32 = vld [vmem:[%s3869_s1 + $0x228] sm:$0xff]  }
  0x70   : > { %3123 = vmatprep.mubr.bf16.mxu0 %v2662_v1  ;;  %v1804_v45 = vrot.slane %v1802_v36, 4  ;;  %v1807_v46 = vrot.slane %v1805_v37, 5  ;;  %v1835_v1 = vrot.slane %v1833_v58, 5  ;;  %v1853_v2 = vshll.u32 %v2767_v56, 16  ;;  %v2773_v36 = vld [vmem:[%s3409_s14 + $0x44] sm:$0x1] }
  0x71   : > { %3154 = vmatpush3.bf16.msra.mxu0 %v3306_v20  ;;  %v1193_v18 = vsel %vm3434_vm2, %v1188_v8, %v1192_v53  ;;  %v1426_v20 = vrot.slane %v2687_v15, 5  ;;  %3147 = vmatprep.mubr.bf16.mxu1 %v2714_v19  ;;  %v1841_v10 = vrot.slane %v1839_v60, 5  ;;  %v2768_v19 = vld [vmem:[%s3409_s14 + $0x30] sm:$0xf]  ;;  %v3325_v37 = vld [vmem:[%s3409_s14 + $0x40] ss:$8 sps:$4 sm:$0xff]  }
  0x72   : > { %3178 = vmatpush3.bf16.msra.mxu1 %v3307_v35  ;;  %3155 = vmatprep.subr.bf16.mxu0 %v3308_v49  ;;  %v2663_v22 = vcombine.low %v1179_v7, %v1193_v18  ;;  %v2763_v35 = vld [vmem:[%s3409_s14 + $0x1c] sm:$0x1]  ;;  %v1808_v53 = vor.u32 %v1807_v46, %v1804_v45  ;;  %v3321_v7 = vld [vmem:[%s3409_s14 + $0x20] ss:$8 sps:$4 sm:$0xff]   ;;  %v1836_v9 = vor.u32 %v1835_v1, %v1832_v0  ;;  %v1855_v11 = vrot.slane %v1853_v2, 5  ;;  %v3323_v18 = vld [vmem:[%s3869_s1 + $0x230] sm:$0xff]  }
  0x73   : > { %3179 = vmatprep.subr.bf16.mxu1 %v3309_v54  ;;  %v1427_v25 = vsel %vm3496_vm5, %v2695_v17, %v1426_v20  ;;  %v1825_v42 = vshll.u32 %v2763_v35, 16  ;;  %v2769_v20 = vld [vmem:[%s3409_s14 + $0x34] sm:$0x1]  ;;  %v2775_v46 = vld [vmem:[%s3409_s14 + $0x4c] sm:$0x1]  ;;  %v3327_v60 = vld [vmem:[%s3869_s1 + $0x220] sm:$0xff]  }
  0x74   : > { %3124 = vmatmul.mubr.bf16.gmra.mxu0 %v2663_v22  ;;  %v2715_v26 = vcombine.low %v1423_v23, %v1427_v25  ;;  %v1809_v63 = vrot.slane %v1808_v53, 4  ;;  %v1837_v16 = vrot.slane %v1836_v9, 4  ;;  %v2770_v22 = vld [vmem:[%s3409_s14 + $0x38] sm:$0xf]  ;;  %v2771_v23 = vld [vmem:[%s3409_s14 + $0x3c] sm:$0x1] }
  0x75   : > { %3156 = vmatpush3.bf16.msra.mxu0 %v3308_v49  ;;  %3167 = vmatprep.mubr.bf16.mxu0 %v3320_v30  ;;  %v1821_v49 = vrot.slane %v1819_v41, 5  ;;  %v1827_v50 = vrot.slane %v1825_v42, 5  ;;  %v1861_v25 = vshll.u32 %v2768_v19, 16  ;;  %v2772_v30 = vld [vmem:[%s3409_s14 + $0x40] sm:$0xf]  ;;  %v1881_v35 = vshll.u32 %v2771_v23, 16 }
  0x76   : > { %3180 = vmatpush3.bf16.msra.mxu1 %v3309_v54  ;;  %3157 = vmatprep.subr.bf16.mxu0 %v3310_v6  ;;  %v2766_v54 = vld [vmem:[%s3409_s14 + $0x28] sm:$0xf]  ;;  %v1814_v8 = vsel %vm3434_vm2, %v1809_v63, %v1813_v47  ;;  %v1889_v47 = vshll.u32 %v2772_v30, 16  ;;  %v1909_v56 = vshll.u32 %v2775_v46, 16  ;;  %v3331_v46 = vld [vmem:[%s3869_s1 + $0x200] sm:$0xff]  }
  0x77   : > { %3181 = vmatprep.subr.bf16.mxu1 %v3311_v12  ;;  %3148 = vmatmul.mubr.bf16.gmra.mxu1 %v2715_v26  ;;  %v1822_v59 = vor.u32 %v1821_v49, %v1818_v48  ;;  %v1844_v61 = vshrl.u32 %v2766_v54, 16  ;;  %v1847_v62 = vshll.u32 %v2766_v54, 16  ;;  %v1863_v34 = vrot.slane %v1861_v25, 5  ;;  %v2774_v42 = vld [vmem:[%s3409_s14 + $0x48] sm:$0xf] }
  0x78   : > { %v1883_v45 = vrot.slane %v1881_v35, 5  ;;  %v1895_v48 = vshll.u32 %v2773_v36, 16  ;;  %v1900_v51 = vshrl.u32 %v2774_v42, 16  ;;  %v1903_v52 = vshll.u32 %v2774_v42, 16  ;;  %v2811_v35 = vld [vmem:[%s3409_s14 + $0x2c] sm:$0x1] }
  0x79   : > { %3158 = vmatpush3.bf16.msra.mxu0 %v3310_v6  ;;  %v1823_v3 = vrot.slane %v1822_v59, 4  ;;  %v1846_v5 = vrot.slane %v1844_v61, 4  ;;  %v1849_v6 = vrot.slane %v1847_v62, 5  ;;  %v1891_v54 = vrot.slane %v1889_v47, 5  ;;  %v3330_v36 = vld [vmem:[%s3869_s1 + $0x208] sm:$0xff]  }
  0x7a   : > { %3182 = vmatpush3.bf16.msra.mxu1 %v3311_v12  ;;  %3159 = vmatprep.subr.bf16.mxu0 %v3312_v21  ;;  %v1902_v58 = vrot.slane %v1900_v51, 4  ;;  %v1905_v59 = vrot.slane %v1903_v52, 5  ;;  %v1897_v63 = vrot.slane %v1895_v48, 5  ;;  %v1911_v0 = vrot.slane %v1909_v56, 5  ;;  %v2816_v42 = vld [vmem:[%s3409_s14 + $0x40] sm:$0xe] }
  0x7b   : > { %3183 = vmatprep.subr.bf16.mxu1 %v3313_v24  ;;  %v1828_v12 = vsel %vm3434_vm2, %v1823_v3, %v1827_v50  ;;  %v1850_v13 = vor.u32 %v1849_v6, %v1846_v5  ;;  %v3328_v6 = vld [vmem:[%s3869_s1 + $0x218] sm:$0xff]   ;;  %v2826_v47 = vrot.slane %v2816_v42, 9 }
  0x7c   : > { %v2792_v15 = vcombine.low %v1814_v8, %v1828_v12  ;;  %v1906_v2 = vor.u32 %v1905_v59, %v1902_v58  ;;  %v2805_v8 = vld [vmem:[%s3409_s14 + $0x14] sm:$0x1] }
  0x7d   : > { %3160 = vmatpush3.bf16.msra.mxu0 %v3312_v21  ;;  %v1851_v17 = vrot.slane %v1850_v13, 4  ;;  %v1842_v21 = vsel %vm3434_vm2, %v1837_v16, %v1841_v10  ;;  %v2806_v10 = vld [vmem:[%s3409_s14 + $0x18] sm:$0xe]  ;;  %v2117_v13 = vrot.slane %v2805_v8, 5 }
  0x7e   : > { %3184 = vmatpush3.bf16.msra.mxu1 %v3313_v24  ;;  %3161 = vmatprep.subr.bf16.mxu0 %v3314_v27  ;;  %v1858_v24 = vshrl.u32 %v2768_v19, 16  ;;  %v1907_v5 = vrot.slane %v1906_v2, 4 }
  0x7f   : > { %3185 = vmatprep.subr.bf16.mxu1 %v3315_v28  ;;  %3191 = vmatprep.mubr.bf16.mxu1 %v2792_v15  ;;  %v1856_v26 = vsel %vm3434_vm2, %v1851_v17, %v1855_v11  ;;  %v2807_v11 = vld [vmem:[%s3409_s14 + $0x1c] sm:$0x1]  ;;  %v2821_v15 = vrot.slane %v2806_v10, 9  ;;  %v2812_v17 = vld [vmem:[%s3409_s14 + $0x30] sm:$0xe] }
  0x80   : > { %v1860_v33 = vrot.slane %v1858_v24, 4  ;;  %v2121_v16 = vrot.slane %v2807_v11, 5  ;;  %v2824_v23 = vrot.slane %v2812_v17, 9 }
  0x81   : > { %3162 = vmatpush3.bf16.msra.mxu0 %v3314_v27  ;;  %v1867_v27 = vshll.u32 %v2769_v20, 16 }
  0x82   : > { %3186 = vmatpush3.bf16.msra.mxu1 %v3315_v28  ;;  %3163 = vmatprep.subr.bf16.mxu0 %v3316_v29  ;;  %v1872_v28 = vshrl.u32 %v2770_v22, 16  ;;  %v2122_v25 = vsel %vm3496_vm5, %v2821_v15, %v2121_v16 }
  0x83   : > { %3187 = vmatprep.subr.bf16.mxu1 %v3317_v31  ;;  %v1869_v38 = vrot.slane %v1867_v27, 5 }
  0x84   : > { %v1874_v39 = vrot.slane %v1872_v28, 4 }
  0x85   : > { %3164 = vmatpush3.bf16.msra.mxu0 %v3316_v29  ;;  %v1875_v29 = vshll.u32 %v2770_v22, 16  ;;  %v2815_v22 = vld [vmem:[%s3409_s14 + $0x3c] sm:$0x1] }
  0x86   : > { %3188 = vmatpush3.bf16.msra.mxu1 %v3317_v31  ;;  %3165 = vmatprep.subr.bf16.mxu0 %v3318_v43  ;;  %v2793_v31 = vcombine.low %v1842_v21, %v1856_v26  ;;  %v2814_v21 = vld [vmem:[%s3409_s14 + $0x38] sm:$0xe]  ;;  %v2137_v27 = vrot.slane %v2815_v22, 5 }
  0x87   : > { %3189 = vmatprep.subr.bf16.mxu1 %v3319_v44  ;;  %v1877_v41 = vrot.slane %v1875_v29, 5  ;;  %v2825_v26 = vrot.slane %v2814_v21, 9 }
  0x89   : > { %3166 = vmatpush3.bf16.msra.mxu0 %v3318_v43  ;;  %v1886_v43 = vshrl.u32 %v2772_v30, 16  ;;  %v1878_v49 = vor.u32 %v1877_v41, %v1874_v39  ;;  %v2138_v30 = vsel %vm3496_vm5, %v2825_v26, %v2137_v27  ;;  %v2129_v41 = vrot.slane %v2811_v35, 5 }
  0x8a   : > { %3190 = vmatpush3.bf16.msra.mxu1 %v3319_v44  ;;  %3199 = vmatprep.subr.bf16.mxu0 %v3322_v4  ;;  %v1864_v44 = vor.u32 %v1863_v34, %v1860_v33  ;;  %v2809_v33 = vld [vmem:[%s3409_s14 + $0x24] sm:$0x1]  ;;  %v2810_v34 = vld [vmem:[%s3409_s14 + $0x28] sm:$0xe] }
  0x8b   : > { %3223 = vmatprep.subr.bf16.mxu1 %v3322_v4  ;;  %v1888_v50 = vrot.slane %v1886_v43, 4  ;;  %v1879_v57 = vrot.slane %v1878_v49, 4  ;;  %v2823_v39 = vrot.slane %v2810_v34, 9  ;;  %v2817_v43 = vld [vmem:[%s3409_s14 + $0x44] sm:$0x1] }
  0x8c   : > { %3168 = vmatmul.mubr.bf16.vlgmr.msra.gmra.mxu0 %v3321_v7  ;;  %v1865_v53 = vrot.slane %v1864_v44, 4  ;;  %v2804_v7 = vld [vmem:[%s3409_s14 + $0x10] sm:$0xe]  ;;  %v2818_v44 = vld [vmem:[%s3409_s14 + $0x48] sm:$0xe]  ;;  %v2141_v48 = vrot.slane %v2817_v43, 5 }
  0x8d   : > { %3200 = vmatpush3.bf16.msra.mxu0 %v3322_v4  ;;  %3171 = vmatprep.mubr.bf16.mxu0 %v3324_v14  ;;  %v1892_v62 = vor.u32 %v1891_v54, %v1888_v50  ;;  %v1884_v1 = vsel %vm3434_vm2, %v1879_v57, %v1883_v45  ;;  %v2820_v12 = vrot.slane %v2804_v7, 9  ;;  %v1912_v14 = vsel %vm3434_vm2, %v1907_v5, %v1911_v0  ;;  %v2819_v45 = vld [vmem:[%s3409_s14 + $0x4c] sm:$0x1] }
  0x8e   : > { %3201 = vmatprep.subr.bf16.mxu0 %v3323_v18  ;;  %3192 = vmatmul.mubr.bf16.vlgmr.msra.gmra.mxu1 %v2793_v31  ;;  %v1870_v61 = vsel %vm3434_vm2, %v1865_v53, %v1869_v38  ;;  %v2808_v31 = vld [vmem:[%s3409_s14 + $0x20] sm:$0xe]  ;;  %v2125_v38 = vrot.slane %v2809_v33, 5  ;;  %v2827_v49 = vrot.slane %v2818_v44, 9  ;;  %v2145_v50 = vrot.slane %v2819_v45, 5 }
  0x8f   : > { %3231 = vmatpush3.bf16.msra.mxu1 %v3322_v4  ;;  %v2794_v3 = vcombine.low %v1870_v61, %v1884_v1  ;;  %v1893_v4 = vrot.slane %v1892_v62, 4  ;;  %v2118_v20 = vsel %vm3496_vm5, %v2820_v12, %v2117_v13  ;;  %v2130_v52 = vsel %vm3496_vm5, %v2823_v39, %v2129_v41 }
  0x90   : > { %3224 = vmatprep.subr.bf16.mxu1 %v3323_v18  ;;  %v2844_v28 = vcombine.low %v2118_v20, %v2122_v25  ;;  %v2142_v54 = vsel %vm3496_vm5, %v2826_v47, %v2141_v48  ;;  %v2146_v56 = vsel %vm3496_vm5, %v2827_v49, %v2145_v50 }
  0x91   : > { %3202 = vmatpush3.bf16.msra.mxu0 %v3323_v18  ;;  %3195 = vmatprep.mubr.bf16.mxu1 %v2794_v3  ;;  %v1898_v9 = vsel %vm3434_vm2, %v1893_v4, %v1897_v63  ;;  %v2847_v57 = vcombine.low %v2142_v54, %v2146_v56 }
  0x92   : > { %3203 = vmatprep.subr.bf16.mxu0 %v3326_v32  ;;  %v2795_v19 = vcombine.low %v1898_v9, %v1912_v14 }
  0x93   : > { %3232 = vmatpush3.bf16.msra.mxu1 %v3323_v18  ;;  %v2813_v18 = vld [vmem:[%s3409_s14 + $0x34] sm:$0x1] }
  0x94   : > { %3172 = vmatmul.mubr.bf16.gmra.mxu0 %v3325_v37  ;;  %3225 = vmatprep.subr.bf16.mxu1 %v3326_v32  ;;  %v2133_v24 = vrot.slane %v2813_v18, 5  ;;  %v2822_v37 = vrot.slane %v2808_v31, 9 }
  0x95   : > { %3204 = vmatpush3.bf16.msra.mxu0 %v3326_v32  ;;  %3215 = vmatprep.mubr.bf16.mxu0 %v2844_v28 }
  0x96   : > { %3205 = vmatprep.subr.bf16.mxu0 %v3327_v60  ;;  %3196 = vmatmul.mubr.bf16.gmra.mxu1 %v2795_v19  ;;  %v2134_v29 = vsel %vm3496_vm5, %v2824_v23, %v2133_v24  ;;  %v2126_v51 = vsel %vm3496_vm5, %v2822_v37, %v2125_v38 }
  0x97   : > { %3233 = vmatpush3.bf16.msra.mxu1 %v3326_v32  ;;  %v2846_v32 = vcombine.low %v2134_v29, %v2138_v30  ;;  %v2845_v53 = vcombine.low %v2126_v51, %v2130_v52 }
  0x98   : > { %3226 = vmatprep.subr.bf16.mxu1 %v3327_v60 }
  0x99   : > { %3206 = vmatpush3.bf16.msra.mxu0 %v3327_v60  ;;  %3219 = vmatprep.mubr.bf16.mxu1 %v2846_v32 }
  0x9a   : > { %3207 = vmatprep.subr.bf16.mxu0 %v3328_v6 }
  0x9b   : > { %3234 = vmatpush3.bf16.msra.mxu1 %v3327_v60 }
  0x9c   : > { %3227 = vmatprep.subr.bf16.mxu1 %v3328_v6 }
  0x9d   : > { %3208 = vmatpush3.bf16.msra.mxu0 %v3328_v6 }
  0x9e   : > { %3209 = vmatprep.subr.bf16.mxu0 %v3329_v40 }
  0x9f   : > { %3235 = vmatpush3.bf16.msra.mxu1 %v3328_v6 }
  0xa0   : > { %3228 = vmatprep.subr.bf16.mxu1 %v3329_v40 }
  0xa1   : > { %3210 = vmatpush3.bf16.msra.mxu0 %v3329_v40 }
  0xa2   : > { %3211 = vmatprep.subr.bf16.mxu0 %v3330_v36 }
  0xa3   : > { %3236 = vmatpush3.bf16.msra.mxu1 %v3329_v40 }
  0xa4   : > { %3229 = vmatprep.subr.bf16.mxu1 %v3330_v36 }
  0xa5   : > { %3212 = vmatpush3.bf16.msra.mxu0 %v3330_v36 }
  0xa6   : > { %3213 = vmatprep.subr.bf16.mxu0 %v3331_v46 }
  0xa7   : > { %3237 = vmatpush3.bf16.msra.mxu1 %v3330_v36 }
  0xa8   : > { %3230 = vmatprep.subr.bf16.mxu1 %v3331_v46 }
  0xa9   : > { %3214 = vmatpush3.bf16.msra.mxu0 %v3331_v46 }
  0xab   : > { %3238 = vmatpush3.bf16.msra.mxu1 %v3331_v46 }
  0xac   : > { %3216 = vmatmul.mubr.bf16.vlgmr.msra.gmra.mxu0 %v2845_v53 }
  0xae   : > { %3220 = vmatmul.mubr.bf16.vlgmr.msra.gmra.mxu1 %v2847_v57 }
  0xec   : > { %v3025_v58 = vpop.f32.mrf.mxu0 }
  0xed   : > { %v3049_v59 = vpop.f32.mrf.mxu1 }
  0xee   : > { %v302_v60 = vpop.f32.mrf.mxu0  ;;  %v628_v49 = vadd.f32 %v3049_v59, %v3025_v58 }
  0xef   : > { %v587_v61 = vpop.f32.mrf.mxu1 }
  0xf0   : > { %v3026_v62 = vpop.f32.mrf.mxu0  ;;  %v626_v48 = vadd.f32 %v587_v61, %v302_v60 }
  0xf1   : > { %v3050_v63 = vpop.f32.mrf.mxu1 }
  0xf2   : > { %v305_v0 = vpop.f32.mrf.mxu0  ;;  %v629_v53 = vadd.f32 %v3050_v63, %v3026_v62 }
  0xf3   : > { %v590_v2 = vpop.f32.mrf.mxu1 }
  0xf4   : > { %v3810_v1 = vpop.f32.mrf.mxu0  ;;  %v627_v54 = vadd.f32 %v590_v2, %v305_v0 }
  0xf5   : > { %3876 = vst [vmem:[#allocation3_spill] sm:$0xff] %v3810_v1 }
  0xf6   : > { %v318_v55 = vpop.f32.mrf.mxu0 }
  0xf8   : > { %v3812_v3 = vpop.f32.mrf.mxu1  ;;  %v3814_v5 = vpop.f32.mrf.mxu0 }
  0xf9   : > { %3877 = vst [vmem:[#allocation4_spill] sm:$0xff] %v3812_v3  ;;  %3878 = vst [vmem:[#allocation5_spill] sm:$0xff] %v3814_v5 }
  0xfa   : > { %v603_v4 = vpop.f32.mrf.mxu1  ;;  %v321_v7 = vpop.f32.mrf.mxu0 }
  0xfb   : > { %v630_v57 = vadd.f32 %v603_v4, %v318_v55 }
  0xfc   : > { %v3816_v6 = vpop.f32.mrf.mxu1  ;;  %v3885_v61 = vld [vmem:[#allocation3_spill] sm:$0xff] }
  0xfd   : > { %3879 = vst [vmem:[#allocation6_spill] sm:$0xff] %v3816_v6 }
  0xfe   : > { %v606_v9 = vpop.f32.mrf.mxu1 }
  0xff   : > { %v631_v5 = vadd.f32 %v606_v9, %v321_v7 }
 0x100   : > { %v3886_v58 = vld [vmem:[#allocation4_spill] sm:$0xff]  ;;  %v3887_v0 = vld [vmem:[#allocation5_spill] sm:$0xff] }
 0x101   : > { %v632_v59 = vadd.f32 %v3886_v58, %v3885_v61 }
 0x104   : > { %v3888_v2 = vld [vmem:[#allocation6_spill] sm:$0xff] }
 0x105   : > { %v633_v55 = vadd.f32 %v3888_v2, %v3887_v0 }
 0x10c   : > { %v3073_v8 = vpop.f32.mrf.mxu0 }
 0x10d   : > { %v3097_v10 = vpop.f32.mrf.mxu1  ;;  %v865_v56 = vadd.f32 %v3073_v8, %v628_v49 }
 0x10e   : > { %v824_v11 = vpop.f32.mrf.mxu0 }
 0x10f   : > { %v1011_v12 = vpop.f32.mrf.mxu1  ;;  %v863_v50 = vadd.f32 %v824_v11, %v626_v48  ;;  %v1052_v3 = vadd.f32 %v3097_v10, %v865_v56 }
 0x110   : > { %v3074_v13 = vpop.f32.mrf.mxu0 }
 0x111   : > { %v3098_v14 = vpop.f32.mrf.mxu1 }
 0x112   : > { %v827_v15 = vpop.f32.mrf.mxu0 }
 0x113   : > { %v1014_v16 = vpop.f32.mrf.mxu1 }
 0x114   : > { %v3077_v17 = vpop.f32.mrf.mxu0 }
 0x115   : > { %v3818_v18 = vpop.f32.mrf.mxu1  ;;  %v869_v4 = vadd.f32 %v3077_v17, %v632_v59 }
 0x116   : > { %3880 = vst [vmem:[#allocation7_spill] sm:$0xff] %v3818_v18  ;;  %v840_v19 = vpop.f32.mrf.mxu0 }
 0x117   : > { %v1027_v20 = vpop.f32.mrf.mxu1  ;;  %v867_v1 = vadd.f32 %v840_v19, %v630_v57 }
 0x118   : > { %v3078_v21 = vpop.f32.mrf.mxu0 }
 0x119   : > { %v3820_v22 = vpop.f32.mrf.mxu1  ;;  %v870_v9 = vadd.f32 %v3078_v21, %v633_v55 }
 0x11a   : > { %3881 = vst [vmem:[#allocation8_spill] sm:$0xff] %v3820_v22  ;;  %v843_v23 = vpop.f32.mrf.mxu0  ;;  %v864_v22 = vadd.f32 %v827_v15, %v627_v54 }
 0x11b   : > { %v1030_v40 = vpop.f32.mrf.mxu1 }
 0x11c   : > { %v1051_v48 = vadd.f32 %v1014_v16, %v864_v22 }
 0x12c   : > { %v3121_v24 = vpop.f32.mrf.mxu0 }
 0x12d   : > { %v3145_v25 = vpop.f32.mrf.mxu1  ;;  %v1350_v62 = vadd.f32 %v3121_v24, %v1052_v3 }
 0x12e   : > { %v1309_v26 = vpop.f32.mrf.mxu0 }
 0x12f   : > { %v1543_v27 = vpop.f32.mrf.mxu1  ;;  %v1584_v19 = vadd.f32 %v3145_v25, %v1350_v62 }
 0x130   : > { %v3122_v28 = vpop.f32.mrf.mxu0 }
 0x131   : > { %v3146_v29 = vpop.f32.mrf.mxu1 }
 0x132   : > { %v1312_v30 = vpop.f32.mrf.mxu0 }
 0x133   : > { %v1546_v31 = vpop.f32.mrf.mxu1  ;;  %v1349_v7 = vadd.f32 %v1312_v30, %v1051_v48 }
 0x134   : > { %v3125_v32 = vpop.f32.mrf.mxu0 }
 0x135   : > { %v1583_v22 = vadd.f32 %v1546_v31, %v1349_v7 }
 0x136   : > { %v1325_v34 = vpop.f32.mrf.mxu0 }
 0x137   : > { %v3822_v33 = vpop.f32.mrf.mxu1 }
 0x138   : > { %3882 = vst [vmem:[#allocation9_spill] sm:$0xff] %v3822_v33  ;;  %v3126_v36 = vpop.f32.mrf.mxu0  ;;  %v1050_v33 = vadd.f32 %v1011_v12, %v863_v50  ;;  %v1054_v12 = vadd.f32 %v1027_v20, %v867_v1 }
 0x139   : > { %v1559_v35 = vpop.f32.mrf.mxu1 }
 0x13a   : > { %v1328_v38 = vpop.f32.mrf.mxu0  ;;  %v1348_v60 = vadd.f32 %v1309_v26, %v1050_v33  ;;  %v1352_v26 = vadd.f32 %v1325_v34, %v1054_v12 }
 0x13b   : > { %v3824_v37 = vpop.f32.mrf.mxu1 }
 0x13c   : > { %3883 = vst [vmem:[#allocation10_spill] sm:$0xff] %v3824_v37  ;;  %v866_v37 = vadd.f32 %v3074_v13, %v629_v53  ;;  %v1582_v15 = vadd.f32 %v1543_v27, %v1348_v60  ;;  %v1586_v20 = vadd.f32 %v1559_v35, %v1352_v26  ;;  %v2856_v35 = vld [vmem:[%s3870_s2] ss:$0 sm:$0xff] }
 0x13d   : > { %v1562_v41 = vpop.f32.mrf.mxu1 }
 0x13e   : > { %v1053_v11 = vadd.f32 %v3098_v14, %v866_v37  ;;  %v3889_v14 = vld [vmem:[#allocation7_spill] sm:$0xff]  ;;  %v3890_v37 = vld [vmem:[#allocation8_spill] sm:$0xff] }
 0x13f   : > { %v1056_v16 = vadd.f32 %v3889_v14, %v869_v4  ;;  %v1057_v17 = vadd.f32 %v3890_v37, %v870_v9 }
 0x140   : > { %v1351_v13 = vadd.f32 %v3122_v28, %v1053_v11 }
 0x141   : > { %v1354_v50 = vadd.f32 %v3125_v32, %v1056_v16  ;;  %v1355_v25 = vadd.f32 %v3126_v36, %v1057_v17 }
 0x142   : > { %v1585_v3 = vadd.f32 %v3146_v29, %v1351_v13  ;;  %v3891_v29 = vld [vmem:[#allocation9_spill] sm:$0xff] }
 0x143   : > { %v1588_v31 = vadd.f32 %v3891_v29, %v1354_v50 }
 0x14c   : > { %v3169_v39 = vpop.f32.mrf.mxu0 }
 0x14d   : > { %v1771_v24 = vadd.f32 %v3169_v39, %v1584_v19 }
 0x14e   : > { %v3193_v42 = vpop.f32.mrf.mxu1  ;;  %v1730_v43 = vpop.f32.mrf.mxu0 }
 0x14f   : > { %v1769_v33 = vadd.f32 %v1730_v43, %v1582_v15  ;;  %v2069_v43 = vadd.f32 %v3193_v42, %v1771_v24 }
 0x150   : > { %v2028_v44 = vpop.f32.mrf.mxu1  ;;  %v3170_v45 = vpop.f32.mrf.mxu0 }
 0x151   : > { %v1772_v27 = vadd.f32 %v3170_v45, %v1585_v3  ;;  %v2067_v28 = vadd.f32 %v2028_v44, %v1769_v33  ;;  %v3892_v45 = vld [vmem:[#allocation10_spill] sm:$0xff] }
 0x152   : > { %v3194_v46 = vpop.f32.mrf.mxu1  ;;  %v1733_v47 = vpop.f32.mrf.mxu0  ;;  %v1589_v36 = vadd.f32 %v3892_v45, %v1355_v25 }
 0x153   : > { %v1770_v21 = vadd.f32 %v1733_v47, %v1583_v22  ;;  %v2070_v39 = vadd.f32 %v3194_v46, %v1772_v27 }
 0x154   : > { %v2031_v51 = vpop.f32.mrf.mxu1  ;;  %v3826_v52 = vpop.f32.mrf.mxu0 }
 0x155   : > { %3884 = vst [vmem:[#allocation11_spill] sm:$0xff] %v3826_v52  ;;  %v868_v52 = vadd.f32 %v843_v23, %v631_v5  ;;  %v2068_v56 = vadd.f32 %v2031_v51, %v1770_v21 }
 0x156   : > { %v3828_v18 = vpop.f32.mrf.mxu1  ;;  %v1746_v6 = vpop.f32.mrf.mxu0 }
 0x157   : > { %v1055_v10 = vadd.f32 %v1030_v40, %v868_v52  ;;  %v1773_v52 = vadd.f32 %v1746_v6, %v1586_v20 }
 0x158   : > { %v2044_v63 = vpop.f32.mrf.mxu1  ;;  %v3174_v8 = vpop.f32.mrf.mxu0 }
 0x159   : > { %v1353_v23 = vadd.f32 %v1328_v38, %v1055_v10  ;;  %v2071_v60 = vadd.f32 %v2044_v63, %v1773_v52  ;;  %v1776_v46 = vadd.f32 %v3174_v8, %v1589_v36 }
 0x15a   : > { %v3198_v49 = vpop.f32.mrf.mxu1  ;;  %v1749_v5 = vpop.f32.mrf.mxu0 }
 0x15b   : > { %v1587_v34 = vadd.f32 %v1562_v41, %v1353_v23  ;;  %v2074_v13 = vadd.f32 %v3198_v49, %v1776_v46 }
 0x15c   : > { %v2047_v40 = vpop.f32.mrf.mxu1  ;;  %v3893_v47 = vld [vmem:[#allocation11_spill] sm:$0xff] }
 0x15d   : > { %v1774_v57 = vadd.f32 %v1749_v5, %v1587_v34  ;;  %v1775_v41 = vadd.f32 %v3893_v47, %v1588_v31 }
 0x15f   : > { %v2072_v51 = vadd.f32 %v2047_v40, %v1774_v57  ;;  %v2073_v2 = vadd.f32 %v3828_v18, %v1775_v41 }
 0x16c   : > { %v3217_v1 = vpop.f32.mrf.mxu0 }
 0x16d   : > { %v2303_v32 = vadd.f32 %v3217_v1, %v2069_v43 }
 0x16e   : > { %v2262_v30 = vpop.f32.mrf.mxu0  ;;  %v3221_v53 = vpop.f32.mrf.mxu1 }
 0x16f   : > { %v2301_v54 = vadd.f32 %v2262_v30, %v2067_v28  ;;  %v3844_v11 = vadd.f32 %v2856_v35, %v2303_v32  ;;  %v2307_v15 = vadd.f32 %v3221_v53, %v2073_v2 }
 0x170   : > { %v3218_v38 = vpop.f32.mrf.mxu0  ;;  %v2278_v44 = vpop.f32.mrf.mxu1 }
 0x171   : > { %v3842_v42 = vadd.f32 %v2856_v35, %v2301_v54  ;;  %v2304_v61 = vadd.f32 %v3218_v38, %v2070_v39  ;;  %v2305_v48 = vadd.f32 %v2278_v44, %v2071_v60  ;;  %v2355_v7 = vmul.f32 %v3844_v11, %v3844_v11 }
 0x172   : > { %v2265_v6 = vpop.f32.mrf.mxu0  ;;  %v3222_v58 = vpop.f32.mrf.mxu1  ;;  %v2338_v5 = vadd.f32 %v2856_v35, %v2307_v15 }
 0x173   : > { %v2302_v59 = vadd.f32 %v2265_v6, %v2068_v56  ;;  %v2353_v55 = vmul.f32 %v3842_v42, %v3842_v42  ;;  %v2335_v4 = vadd.f32 %v2856_v35, %v2304_v61  ;;  %v2336_v9 = vadd.f32 %v2856_v35, %v2305_v48 }
 0x174   : > { %v2281_v0 = vpop.f32.mrf.mxu1  ;;  %v2308_v19 = vadd.f32 %v3222_v58, %v2074_v13  ;;  %v2359_v50 = vmul.f32 %v2338_v5, %v2338_v5 }
 0x175   : > { %v3846_v62 = vadd.f32 %v2856_v35, %v2302_v59  ;;  %v2306_v8 = vadd.f32 %v2281_v0, %v2072_v51  ;;  %v2356_v26 = vmul.f32 %v2335_v4, %v2335_v4  ;;  %v2357_v3 = vmul.f32 %v2336_v9, %v2336_v9 }
 0x176   : > { %v2339_v24 = vadd.f32 %v2856_v35, %v2308_v19 }
 0x177   : > { %v2340_v63 = vadd.f32 %v3846_v62, %v3842_v42  ;;  %v2354_v12 = vmul.f32 %v3846_v62, %v3846_v62  ;;  %v2337_v14 = vadd.f32 %v2856_v35, %v2306_v8 }
 0x178   : > { %v2360_v27 = vmul.f32 %v2339_v24, %v2339_v24 }
 0x179   : > { %v2341_v10 = vadd.f32 %v2340_v63, %v3844_v11  ;;  %v2361_v18 = vadd.f32 %v2354_v12, %v2353_v55  ;;  %v2358_v49 = vmul.f32 %v2337_v14, %v2337_v14 }
 0x17b   : > { %v2362_v33 = vadd.f32 %v2361_v18, %v2355_v7  ;;  %v2342_v16 = vadd.f32 %v2341_v10, %v2335_v4 }
 0x17d   : > { %v2343_v22 = vadd.f32 %v2342_v16, %v2336_v9  ;;  %v2363_v23 = vadd.f32 %v2362_v33, %v2356_v26 }
 0x17f   : > { %v2344_v37 = vadd.f32 %v2343_v22, %v2337_v14  ;;  %v2364_v17 = vadd.f32 %v2363_v23, %v2357_v3 }
 0x181   : > { %v2345_v1 = vadd.f32 %v2344_v37, %v2338_v5  ;;  %v2365_v20 = vadd.f32 %v2364_v17, %v2358_v49 }
 0x183   : > { %v2346_v28 = vadd.f32 %v2345_v1, %v2339_v24  ;;  %v2366_v21 = vadd.f32 %v2365_v20, %v2359_v50 }
 0x185   : > { %v2347_v40 = vrot.slane %v2346_v28, 4  ;;  %v2367_v25 = vadd.f32 %v2366_v21, %v2360_v27 }
 0x187   : > { %v2348_v30 = vadd.f32 %v2347_v40, %v2346_v28  ;;  %v2368_v34 = vrot.slane %v2367_v25, 4 }
 0x189   : > { %v2349_v43 = vrot.slane %v2348_v30, 2  ;;  %v2369_v52 = vadd.f32 %v2368_v34, %v2367_v25 }
 0x18b   : > { %v2350_v53 = vadd.f32 %v2349_v43, %v2348_v30  ;;  %v2370_v54 = vrot.slane %v2369_v52, 2 }
 0x18d   : > { %v2351_v29 = vrot.slane %v2350_v53, 1  ;;  %v2371_v31 = vadd.f32 %v2370_v54, %v2369_v52 }
 0x18f   : > { %v2352_v38 = vadd.f32 %v2351_v29, %v2350_v53  ;;  %v2372_v39 = vrot.slane %v2371_v31, 1 }
 0x191   : > { %v2373_v56 = vadd.f32 %v2372_v39, %v2371_v31  ;;  %v2374_v57 = vmul.f32 0.015625, %v2352_v38 }
 0x193   : > { %v2375_v32 = vmul.f32 0.015625, %v2373_v56  ;;  %v2376_v35 = vmul.f32 %v2374_v57, %v2374_v57  ;;  %v2379_v47 = vsub.f32 %v3842_v42, %v2374_v57  ;;  %v2380_v41 = vsub.f32 %v3846_v62, %v2374_v57 }
 0x194   : > { %v2381_v6 = vsub.f32 %v3844_v11, %v2374_v57  ;;  %v2382_v60 = vsub.f32 %v2335_v4, %v2374_v57  ;;  %v2383_v58 = vsub.f32 %v2336_v9, %v2374_v57  ;;  %v2384_v59 = vsub.f32 %v2337_v14, %v2374_v57 }
 0x195   : > { %v2377_v44 = vsub.f32 %v2375_v32, %v2376_v35  ;;  %v2385_v46 = vsub.f32 %v2338_v5, %v2374_v57  ;;  %v2386_v51 = vsub.f32 %v2339_v24, %v2374_v57 }
 0x197   : > { %v2378_v45 = vmax.f32 %v2377_v44, 0.0 }
 0x199   : > { %v2387_v36 = vadd.f32 1e-05, %v2378_v45 }
 0x19b   : > { %3332 = vrsqrt.f32 %v2387_v36 }
 0x1a8   : > { %v3333_v61 = vpop.eup %3332 }
 0x1a9   : > { %v2389_v48 = vmul.f32 %v3333_v61, %v2379_v47  ;;  %v2390_v0 = vmul.f32 %v3333_v61, %v2380_v41  ;;  %v2391_v2 = vmul.f32 %v3333_v61, %v2381_v6  ;;  %v2392_v55 = vmul.f32 %v3333_v61, %v2382_v60 }
 0x1aa   : > { %v2393_v63 = vmul.f32 %v3333_v61, %v2383_v58  ;;  %v2394_v12 = vmul.f32 %v3333_v61, %v2384_v59  ;;  %v2395_v8 = vmul.f32 %v3333_v61, %v2385_v46  ;;  %v2396_v13 = vmul.f32 %v3333_v61, %v2386_v51 }
 0x1ab   : > { %v2397_v42 = vmul.f32 0.2, %v2389_v48  ;;  %v2398_v15 = vmul.f32 0.2, %v2390_v0  ;;  %v2399_v62 = vmul.f32 0.2, %v2391_v2 }
 0x1ac   : > { %v2400_v7 = vmul.f32 0.2, %v2392_v55  ;;  %v2401_v11 = vmul.f32 0.2, %v2393_v63  ;;  %v2402_v4 = vmul.f32 0.2, %v2394_v12 }
 0x1ad   : > { %v2403_v10 = vmul.f32 0.2, %v2395_v8  ;;  %v2404_v9 = vmul.f32 0.2, %v2396_v13  ;;  %v2405_v18 = vmax.f32 %v2389_v48, %v2397_v42  ;;  %v2406_v19 = vmax.f32 %v2390_v0, %v2398_v15 }
 0x1ae   : > { %v2407_v26 = vmax.f32 %v2391_v2, %v2399_v62  ;;  %v2408_v33 = vmax.f32 %v2392_v55, %v2400_v7  ;;  %v2409_v14 = vmax.f32 %v2393_v63, %v2401_v11  ;;  %v2410_v16 = vmax.f32 %v2394_v12, %v2402_v4 }
 0x1af   : > { %v2411_v5 = vmax.f32 %v2395_v8, %v2403_v10  ;;  %v2412_v3 = vmax.f32 %v2396_v13, %v2404_v9  ;;  %v2879_v22 = vpack.c.bf16 %v2406_v19, %v2405_v18 }
 0x1b0   : > { %v2884_v23 = vpack.c.bf16 %v2408_v33, %v2407_v26  ;;  %v2889_v24 = vpack.c.bf16 %v2410_v16, %v2409_v14 }
 0x1b1   : > { %2880 = vst [vmem:[%s170_s21] sm:$0xff] %v2879_v22   ;;  %v2894_v37 = vpack.c.bf16 %v2412_v3, %v2411_v5 }
 0x1b2   : > { %2896 = vst [vmem:[%s170_s21 + $0x8] sm:$0xff] %v2884_v23   ;;  %2897 = vst [vmem:[%s170_s21 + $0x10] sm:$0xff] %v2889_v24  }
 0x1b3   : > { %2898 = vst [vmem:[%s170_s21 + $0x18] sm:$0xff] %v2894_v37  }
 0x1b4 PF: > { %s13_s12 = sadd.s32 1, %s3340_s12  }
 0x1b5   : > { %p10_p4 = scmp.ge.s32.totalorder %s13_s12, 4  }
 0x1b7   :  { %12 = sbr.rel (!%p10_p4) target bundleno = 1 (0x1), region = 72 }

</bundles_post_ra>
